<compile_context>
chip_gen: v5e
topology: v5e:2x2
jax: 0.10.0
libtpu: 0.0.40
codegen_flags: <defaults>
</compile_context>

<pallas_src>
import functools

import jax
import jax.numpy as jnp
from jax.experimental import pallas as pl
from jax.experimental.pallas import tpu as pltpu

# ---- small synthetic CLIP text-encoder config (real model: D=768, H=12, L=12, S=77) ----
VOCAB = 1000
D = 64           # hidden size (real CLIP-L D=768 is lane-dense; D=64 here is toy-scale)
H = 4            # attention heads
HD = D // H      # head dim
FF = 4 * D       # MLP intermediate
LAYERS = 2
SEQ = 8          # max_length (small)
B = 4
EPS = 1e-5       # CLIP LayerNorm eps

# TODO(synk): the CLIPTokenizer (string -> input_ids) has no Pallas equivalent;
# this implementation consumes precomputed token ids.


def _ln(x, w, b):
    """LayerNorm in f32 (biased variance, eps=1e-5), matching HF CLIP."""
    mu = jnp.mean(x, axis=-1, keepdims=True)
    var = jnp.mean((x - mu) ** 2, axis=-1, keepdims=True)
    return (x - mu) * jax.lax.rsqrt(var + EPS) * w + b


def clip_encoder_kernel(x_ref, mask_ref, vec_ref, qw_ref, kw_ref, vw_ref, ow_ref,
                        f1w_ref, f1b_ref, f2w_ref, lnf_ref, o_ref,
                        *, seq, heads, mlp_rows):
    """One grid step == one transformer layer for one row block of sequences.

    The residual stream is the resident output block o_ref (no activation scratch).
    """
    layer = pl.program_id(1)

    # Load the embedded tokens into the resident output block once per row block.
    @pl.when(layer == 0)
    def _():
        o_ref[...] = x_ref[...]

    x = o_ref[...]                                   # (rows, D) f32 residual stream
    rows, d = x.shape
    hd = d // heads
    nseq = rows // seq                               # whole sequences per row block

    # Packed tiny per-layer params: [ln1w, ln1b, qb, kb, vb, ob, ln2w, ln2b, f2b].
    vec = vec_ref[...]                               # (9, D) f32
    ln1w, ln1b = vec[0:1], vec[1:2]
    qb, kb, vb, ob = vec[2:3], vec[3:4], vec[4:5], vec[5:6]
    ln2w, ln2b, f2b = vec[6:7], vec[7:8], vec[8:9]

    # ---- causal multi-head self-attention (pre-LN); scale pre-folded into qw/qb ----
    h = _ln(x, ln1w, ln1b).astype(jnp.bfloat16)
    q = jnp.dot(h, qw_ref[...], preferred_element_type=jnp.float32) + qb
    k = jnp.dot(h, kw_ref[...], preferred_element_type=jnp.float32) + kb
    v = jnp.dot(h, vw_ref[...], preferred_element_type=jnp.float32) + vb

    mask = mask_ref[...]                             # (S, S); broadcasts over sequences

    head_outs = []
    for i in range(heads):                           # static unroll; scores batched over sequences
        qs = q[:, i * hd:(i + 1) * hd].reshape(nseq, seq, hd).astype(jnp.bfloat16)
        ks = k[:, i * hd:(i + 1) * hd].reshape(nseq, seq, hd).astype(jnp.bfloat16)
        vs = v[:, i * hd:(i + 1) * hd].reshape(nseq, seq, hd).astype(jnp.bfloat16)
        s = jnp.einsum('bqd,bkd->bqk', qs, ks,
                       preferred_element_type=jnp.float32) + mask
        s = s - jnp.max(s, axis=-1, keepdims=True)   # stable softmax
        p = jnp.exp(s)
        p = p * pl.reciprocal(jnp.sum(p, axis=-1, keepdims=True), approx=True)
        ho = jnp.einsum('bqk,bkd->bqd', p.astype(jnp.bfloat16), vs,
                        preferred_element_type=jnp.float32)
        head_outs.append(ho.reshape(rows, hd))
    attn = jnp.concatenate(head_outs, axis=-1).astype(jnp.bfloat16)      # (rows, D)
    x = x + jnp.dot(attn, ow_ref[...], preferred_element_type=jnp.float32) + ob
    o_ref[...] = x                                   # attention residual back to the stream

    # ---- MLP (pre-LN, QuickGELU), row-chunked to bound the (rows, FF) f32 intermediate ----
    f1b = f1b_ref[...]                               # (1, FF)

    def mlp_rows_at(r0):
        sl = pl.ds(r0, mlp_rows)
        xc = o_ref[sl, :]
        h2 = _ln(xc, ln2w, ln2b).astype(jnp.bfloat16)
        m = jnp.dot(h2, f1w_ref[...], preferred_element_type=jnp.float32) + f1b
        m = m * jax.nn.sigmoid(1.702 * m)            # QuickGELU (openai/clip-vit-large-patch14)
        m = jnp.dot(m.astype(jnp.bfloat16), f2w_ref[...],
                    preferred_element_type=jnp.float32) + f2b
        o_ref[sl, :] = xc + m

    n_chunks = rows // mlp_rows
    if n_chunks == 1:
        mlp_rows_at(0)
    else:
        def body(c, carry):
            mlp_rows_at(pl.multiple_of(c * mlp_rows, 8))
            return carry
        jax.lax.fori_loop(0, n_chunks, body, 0)

    # Final LayerNorm fused into the last layer step (in place on the resident block).
    @pl.when(layer == pl.num_programs(1) - 1)
    def _():
        lnf = lnf_ref[...]                           # (2, D): row 0 = weight, row 1 = bias
        o_ref[...] = _ln(o_ref[...], lnf[0:1], lnf[1:2])


def _largest_row_chunk(rows, cap=512):
    """Largest multiple-of-8 divisor of `rows` that is <= cap (rows is a multiple of 8)."""
    c = max(8, (min(rows, cap) // 8) * 8)
    while rows % c:
        c -= 8
    return c


def build_causal_mask(seq):
    row = jnp.arange(seq)[:, None]
    col = jnp.arange(seq)[None, :]
    return jnp.where(col > row, jnp.finfo(jnp.float32).min, 0.0).astype(jnp.float32)


def clip_text_encoder(x, lp, lnf, *, heads, seqs_per_block=None, mlp_chunk_rows=None,
                      vmem_limit_bytes=48 * 1024 * 1024):
    """x: (B, S, D) f32 embeddings. Runs all layers + final LN in one pallas_call."""
    Bv, S, Dv = x.shape
    L, _, FFv = lp['f1w'].shape

    # Pad S to a sublane multiple so in-kernel reshapes are free re-tilings; padded keys
    # are masked by the causal mask, padded query rows are sliced off afterwards.
    S_pad = -(-S // 8) * 8
    if S_pad != S:
        x = jnp.pad(x, ((0, 0), (0, S_pad - S), (0, 0)))

    if seqs_per_block is None:
        seqs_per_block = Bv                          # at scale: pick a divisor of B giving
    assert Bv % seqs_per_block == 0                  # >=256 rows/block and >=2 blocks (v7x)
    nb = Bv // seqs_per_block
    rows_pb = seqs_per_block * S_pad
    if mlp_chunk_rows is None:
        mlp_chunk_rows = _largest_row_chunk(rows_pb)
    assert rows_pb % mlp_chunk_rows == 0 and mlp_chunk_rows % 8 == 0

    N = Bv * S_pad
    x2 = x.reshape(N, Dv)
    mask = build_causal_mask(S_pad)

    def layer_spec(shape):                           # shape excludes the stacked layer dim
        nd = len(shape)
        return pl.BlockSpec((None,) + shape, lambda b, l, _nd=nd: (l,) + (0,) * _nd)

    # Constant-index inputs (mask, final LN) are only DMA'd once per row block since
    # their block index never changes along the inner (layer) axis.
    in_specs = [
        pl.BlockSpec((rows_pb, Dv), lambda b, l: (b, 0)),    # embeddings (row block)
        pl.BlockSpec((S_pad, S_pad), lambda b, l: (0, 0)),   # causal mask
        layer_spec((9, Dv)),                                 # packed LN weights / biases
        layer_spec((Dv, Dv)), layer_spec((Dv, Dv)),          # q, k proj weights
        layer_spec((Dv, Dv)), layer_spec((Dv, Dv)),          # v, out proj weights
        layer_spec((Dv, FFv)), layer_spec((1, FFv)),         # fc1 w, b
        layer_spec((FFv, Dv)),                               # fc2 w
        pl.BlockSpec((2, Dv), lambda b, l: (0, 0)),          # final LN (w, b)
    ]

    kernel = functools.partial(clip_encoder_kernel, seq=S_pad, heads=heads,
                               mlp_rows=mlp_chunk_rows)

    out = pl.pallas_call(
        kernel,
        out_shape=jax.ShapeDtypeStruct((N, Dv), jnp.float32),
        grid=(nb, L),
        in_specs=in_specs,
        out_specs=pl.BlockSpec((rows_pb, Dv), lambda b, l: (b, 0)),
        compiler_params=pltpu.CompilerParams(
            # row blocks shard across TensorCores (v7x); layers are sequential
            dimension_semantics=("parallel", "arbitrary"),
            # explicit scoped-VMEM budget; tune per generation at CLIP-L scale
            # (double-buffered bf16 layer weights already exceed the defaults there).
            vmem_limit_bytes=vmem_limit_bytes,
        ),
    )(x2, mask, lp['vec'], lp['qw'], lp['kw'], lp['vw'], lp['ow'],
      lp['f1w'], lp['f1b'], lp['f2w'], lnf)

    return out.reshape(Bv, S_pad, Dv)[:, :S, :]


def init_params(key):
    def nrm(k, shape, scale=0.02):
        return scale * jax.random.normal(k, shape, dtype=jnp.float32)

    keys = jax.random.split(key, 8)
    attn_scale = HD ** -0.5

    zD = jnp.zeros((LAYERS, D), jnp.float32)
    oD = jnp.ones((LAYERS, D), jnp.float32)
    # Packed per-layer small tensors: [ln1w, ln1b, qb, kb, vb, ob, ln2w, ln2b, f2b].
    # NOTE: when loading pretrained weights, qb (index 2) must also be multiplied by
    # attn_scale (here the biases are zero so the fold is trivial).
    vec = jnp.stack([oD, zD, zD, zD, zD, zD, oD, zD, zD], axis=1)       # (L, 9, D)

    return {
        'tok_emb': nrm(keys[0], (VOCAB, D)),
        'pos_emb': nrm(keys[1], (SEQ, D)),
        'lnf': jnp.stack([jnp.ones((D,), jnp.float32),
                          jnp.zeros((D,), jnp.float32)], axis=0),        # (2, D)
        'layers': {
            'vec': vec,
            # Attention scale folded into the Q projection (one-time constant transform).
            'qw': (nrm(keys[2], (LAYERS, D, D)) * attn_scale).astype(jnp.bfloat16),
            'kw': nrm(keys[3], (LAYERS, D, D)).astype(jnp.bfloat16),
            'vw': nrm(keys[4], (LAYERS, D, D)).astype(jnp.bfloat16),
            'ow': nrm(keys[5], (LAYERS, D, D)).astype(jnp.bfloat16),
            'f1w': nrm(keys[6], (LAYERS, D, FF)).astype(jnp.bfloat16),
            'f1b': jnp.zeros((LAYERS, 1, FF), jnp.float32),
            'f2w': nrm(keys[7], (LAYERS, FF, D)).astype(jnp.bfloat16),
        },
    }


def frozen_clip_embedder(tokens, params, *, seqs_per_block=None, mlp_chunk_rows=None):
    """tokens: (B, SEQ) int32 input_ids. Returns (last_hidden_state, pooler_output)."""
    tok_emb = jnp.take(params['tok_emb'], tokens, axis=0)      # glue: embedding gather
    x = tok_emb + params['pos_emb'][None, :, :]
    last_hidden = clip_text_encoder(x, params['layers'], params['lnf'], heads=H,
                                    seqs_per_block=seqs_per_block,
                                    mlp_chunk_rows=mlp_chunk_rows)
    eot = jnp.argmax(tokens, axis=-1)                          # HF CLIPTextModel pooling
    pooled = last_hidden[jnp.arange(tokens.shape[0]), eot]
    return last_hidden, pooled


if __name__ == "__main__":
    key = jax.random.PRNGKey(0)
    pkey, tkey = jax.random.split(key)
    params = init_params(pkey)
    tokens = jax.random.randint(tkey, (B, SEQ), 1, VOCAB, dtype=jnp.int32)

    # seqs_per_block=2 -> grid (2 row blocks, L layers); mlp_chunk_rows=8 exercises the
    # row-chunked MLP loop (2 chunks of 8 rows per 16-row block).
    fn = jax.jit(functools.partial(frozen_clip_embedder,
                                   seqs_per_block=2, mlp_chunk_rows=8))
    last_hidden, pooled = fn(tokens, params)
    jax.block_until_ready((last_hidden, pooled))

    assert last_hidden.shape == (B, SEQ, D) and last_hidden.dtype == jnp.float32
    assert pooled.shape == (B, D) and pooled.dtype == jnp.float32
    assert bool(jnp.all(jnp.isfinite(last_hidden))) and bool(jnp.all(jnp.isfinite(pooled)))
    print("KERNEL_OK")
</pallas_src>

<mosaic_0001>
module attributes {stable_mosaic.version = 11 : i64} {
  func.func @clip_encoder_kernel(%arg0: i32, %arg1: i32, %arg2: memref<16x64xf32, #tpu.memory_space<vmem>>, %arg3: memref<8x8xf32, #tpu.memory_space<vmem>>, %arg4: memref<1x9x64xf32, #tpu.memory_space<vmem>>, %arg5: memref<1x64x64xbf16, #tpu.memory_space<vmem>>, %arg6: memref<1x64x64xbf16, #tpu.memory_space<vmem>>, %arg7: memref<1x64x64xbf16, #tpu.memory_space<vmem>>, %arg8: memref<1x64x64xbf16, #tpu.memory_space<vmem>>, %arg9: memref<1x64x256xbf16, #tpu.memory_space<vmem>>, %arg10: memref<1x1x256xf32, #tpu.memory_space<vmem>>, %arg11: memref<1x256x64xbf16, #tpu.memory_space<vmem>>, %arg12: memref<2x64xf32, #tpu.memory_space<vmem>>, %arg13: memref<16x64xf32, #tpu.memory_space<vmem>>) attributes {dimension_semantics = [#tpu.dimension_semantics<parallel>, #tpu.dimension_semantics<arbitrary>], iteration_bounds = array<i64: 2, 2>, scalar_prefetch = 0 : i64, scratch_operands = 0 : i64, tpu.core_type = #tpu.core_type<tc>, window_params = [{transform_indices = @transform_0, window_bounds = array<i64: 16, 64>}, {pipeline_mode = #tpu.pipeline_mode<synchronous>, transform_indices = @transform_1, window_bounds = array<i64: 8, 8>}, {transform_indices = @transform_2, window_bounds = array<i64: 1, 9, 64>}, {transform_indices = @transform_3, window_bounds = array<i64: 1, 64, 64>}, {transform_indices = @transform_4, window_bounds = array<i64: 1, 64, 64>}, {transform_indices = @transform_5, window_bounds = array<i64: 1, 64, 64>}, {transform_indices = @transform_6, window_bounds = array<i64: 1, 64, 64>}, {transform_indices = @transform_7, window_bounds = array<i64: 1, 64, 256>}, {transform_indices = @transform_8, window_bounds = array<i64: 1, 1, 256>}, {transform_indices = @transform_9, window_bounds = array<i64: 1, 256, 64>}, {pipeline_mode = #tpu.pipeline_mode<synchronous>, transform_indices = @transform_10, window_bounds = array<i64: 2, 64>}, {transform_indices = @transform_11, window_bounds = array<i64: 16, 64>}]} {
    %c0_i32 = arith.constant 0 : i32
    %0 = arith.cmpi eq, %arg1, %c0_i32 : i32
    %1 = arith.extui %0 : i1 to i32
    %c0_i32_0 = arith.constant 0 : i32
    %2 = arith.cmpi ne, %1, %c0_i32_0 : i32
    scf.if %2 {
      %c0_52 = arith.constant 0 : index
      %c0_53 = arith.constant 0 : index
      %173 = vector.load %arg2[%c0_52, %c0_53] : memref<16x64xf32, #tpu.memory_space<vmem>>, vector<16x64xf32>
      %c0_54 = arith.constant 0 : index
      %c0_55 = arith.constant 0 : index
      %174 = vector.load %arg13[%c0_54, %c0_55] : memref<16x64xf32, #tpu.memory_space<vmem>>, vector<16x64xf32>
      tpu.vector_store %arg13[%c0_54, %c0_55], %173 {strides = array<i32>} : memref<16x64xf32, #tpu.memory_space<vmem>>, vector<16x64xf32>,
    } else {
    }
    %c0 = arith.constant 0 : index
    %c0_1 = arith.constant 0 : index
    %3 = vector.load %arg13[%c0, %c0_1] : memref<16x64xf32, #tpu.memory_space<vmem>>, vector<16x64xf32>
    %c0_2 = arith.constant 0 : index
    %c0_3 = arith.constant 0 : index
    %c0_4 = arith.constant 0 : index
    %4 = vector.load %arg4[%c0_2, %c0_3, %c0_4] : memref<1x9x64xf32, #tpu.memory_space<vmem>>, vector<1x9x64xf32>
    %5 = vector.shape_cast %4 : vector<1x9x64xf32> to vector<9x64xf32>
    %6 = vector.extract_strided_slice %5 {offsets = [0, 0], sizes = [1, 64], strides = [1, 1]} : vector<9x64xf32> to vector<1x64xf32>
    %7 = vector.extract_strided_slice %5 {offsets = [1, 0], sizes = [1, 64], strides = [1, 1]} : vector<9x64xf32> to vector<1x64xf32>
    %8 = vector.extract_strided_slice %5 {offsets = [2, 0], sizes = [1, 64], strides = [1, 1]} : vector<9x64xf32> to vector<1x64xf32>
    %9 = vector.extract_strided_slice %5 {offsets = [3, 0], sizes = [1, 64], strides = [1, 1]} : vector<9x64xf32> to vector<1x64xf32>
    %10 = vector.extract_strided_slice %5 {offsets = [4, 0], sizes = [1, 64], strides = [1, 1]} : vector<9x64xf32> to vector<1x64xf32>
    %11 = vector.extract_strided_slice %5 {offsets = [5, 0], sizes = [1, 64], strides = [1, 1]} : vector<9x64xf32> to vector<1x64xf32>
    %12 = vector.extract_strided_slice %5 {offsets = [6, 0], sizes = [1, 64], strides = [1, 1]} : vector<9x64xf32> to vector<1x64xf32>
    %13 = vector.extract_strided_slice %5 {offsets = [7, 0], sizes = [1, 64], strides = [1, 1]} : vector<9x64xf32> to vector<1x64xf32>
    %14 = vector.extract_strided_slice %5 {offsets = [8, 0], sizes = [1, 64], strides = [1, 1]} : vector<9x64xf32> to vector<1x64xf32>
    %cst = arith.constant dense<0.000000e+00> : vector<16xf32>
    %15 = vector.multi_reduction <add>, %3, %cst [1] : vector<16x64xf32> to vector<16xf32>
    %16 = vector.shape_cast %15 : vector<16xf32> to vector<16x1xf32>
    %cst_5 = arith.constant 6.400000e+01 : f32
    %17 = vector.broadcast %cst_5 : f32 to vector<16x1xf32>
    %18 = arith.divf %16, %17 : vector<16x1xf32>
    %19 = vector.broadcast %18 : vector<16x1xf32> to vector<16x64xf32>
    %20 = arith.subf %3, %19 : vector<16x64xf32>
    %21 = arith.mulf %20, %20 : vector<16x64xf32>
    %cst_6 = arith.constant dense<0.000000e+00> : vector<16xf32>
    %22 = vector.multi_reduction <add>, %21, %cst_6 [1] : vector<16x64xf32> to vector<16xf32>
    %23 = vector.shape_cast %22 : vector<16xf32> to vector<16x1xf32>
    %cst_7 = arith.constant 6.400000e+01 : f32
    %24 = vector.broadcast %cst_7 : f32 to vector<16x1xf32>
    %25 = arith.divf %23, %24 : vector<16x1xf32>
    %26 = vector.broadcast %18 : vector<16x1xf32> to vector<16x64xf32>
    %27 = arith.subf %3, %26 : vector<16x64xf32>
    %cst_8 = arith.constant 9.99999974E-6 : f32
    %28 = vector.broadcast %cst_8 : f32 to vector<16x1xf32>
    %29 = arith.addf %25, %28 : vector<16x1xf32>
    %30 = math.rsqrt %29 : vector<16x1xf32>
    %31 = vector.broadcast %30 : vector<16x1xf32> to vector<16x64xf32>
    %32 = arith.mulf %27, %31 : vector<16x64xf32>
    %33 = vector.broadcast %6 : vector<1x64xf32> to vector<16x64xf32>
    %34 = arith.mulf %32, %33 : vector<16x64xf32>
    %35 = vector.broadcast %7 : vector<1x64xf32> to vector<16x64xf32>
    %36 = arith.addf %34, %35 : vector<16x64xf32>
    %37 = arith.truncf %36 : vector<16x64xf32> to vector<16x64xbf16>
    %c0_9 = arith.constant 0 : index
    %c0_10 = arith.constant 0 : index
    %c0_11 = arith.constant 0 : index
    %38 = vector.load %arg5[%c0_9, %c0_10, %c0_11] : memref<1x64x64xbf16, #tpu.memory_space<vmem>>, vector<1x64x64xbf16>
    %39 = vector.shape_cast %38 : vector<1x64x64xbf16> to vector<64x64xbf16>
    %cst_12 = arith.constant dense<0.000000e+00> : vector<16x64xf32>
    %40 = tpu.matmul %37, %39, %cst_12 {dimension_numbers = #tpu.dot_dimension_numbers<[1], [0], [0], [1], [0, 0, 1, 1], [], []>} : vector<16x64xbf16>, vector<64x64xbf16>, vector<16x64xf32> -> vector<16x64xf32>
    %41 = vector.broadcast %8 : vector<1x64xf32> to vector<16x64xf32>
    %42 = arith.addf %40, %41 : vector<16x64xf32>
    %c0_13 = arith.constant 0 : index
    %c0_14 = arith.constant 0 : index
    %c0_15 = arith.constant 0 : index
    %43 = vector.load %arg6[%c0_13, %c0_14, %c0_15] : memref<1x64x64xbf16, #tpu.memory_space<vmem>>, vector<1x64x64xbf16>
    %44 = vector.shape_cast %43 : vector<1x64x64xbf16> to vector<64x64xbf16>
    %cst_16 = arith.constant dense<0.000000e+00> : vector<16x64xf32>
    %45 = tpu.matmul %37, %44, %cst_16 {dimension_numbers = #tpu.dot_dimension_numbers<[1], [0], [0], [1], [0, 0, 1, 1], [], []>} : vector<16x64xbf16>, vector<64x64xbf16>, vector<16x64xf32> -> vector<16x64xf32>
    %46 = vector.broadcast %9 : vector<1x64xf32> to vector<16x64xf32>
    %47 = arith.addf %45, %46 : vector<16x64xf32>
    %c0_17 = arith.constant 0 : index
    %c0_18 = arith.constant 0 : index
    %c0_19 = arith.constant 0 : index
    %48 = vector.load %arg7[%c0_17, %c0_18, %c0_19] : memref<1x64x64xbf16, #tpu.memory_space<vmem>>, vector<1x64x64xbf16>
    %49 = vector.shape_cast %48 : vector<1x64x64xbf16> to vector<64x64xbf16>
    %cst_20 = arith.constant dense<0.000000e+00> : vector<16x64xf32>
    %50 = tpu.matmul %37, %49, %cst_20 {dimension_numbers = #tpu.dot_dimension_numbers<[1], [0], [0], [1], [0, 0, 1, 1], [], []>} : vector<16x64xbf16>, vector<64x64xbf16>, vector<16x64xf32> -> vector<16x64xf32>
    %51 = vector.broadcast %10 : vector<1x64xf32> to vector<16x64xf32>
    %52 = arith.addf %50, %51 : vector<16x64xf32>
    %c0_21 = arith.constant 0 : index
    %c0_22 = arith.constant 0 : index
    %53 = vector.load %arg3[%c0_21, %c0_22] : memref<8x8xf32, #tpu.memory_space<vmem>>, vector<8x8xf32>
    %54 = vector.extract_strided_slice %42 {offsets = [0, 0], sizes = [16, 16], strides = [1, 1]} : vector<16x64xf32> to vector<16x16xf32>
    %55 = vector.shape_cast %54 : vector<16x16xf32> to vector<2x8x16xf32>
    %56 = arith.truncf %55 : vector<2x8x16xf32> to vector<2x8x16xbf16>
    %57 = vector.extract_strided_slice %47 {offsets = [0, 0], sizes = [16, 16], strides = [1, 1]} : vector<16x64xf32> to vector<16x16xf32>
    %58 = vector.shape_cast %57 : vector<16x16xf32> to vector<2x8x16xf32>
    %59 = arith.truncf %58 : vector<2x8x16xf32> to vector<2x8x16xbf16>
    %60 = vector.extract_strided_slice %52 {offsets = [0, 0], sizes = [16, 16], strides = [1, 1]} : vector<16x64xf32> to vector<16x16xf32>
    %61 = vector.shape_cast %60 : vector<16x16xf32> to vector<2x8x16xf32>
    %62 = arith.truncf %61 : vector<2x8x16xf32> to vector<2x8x16xbf16>
    "tpu.trace_start"() <{level = 10 : i32, message = "bqd,bkd->bqk"}> : () -> ()
    %cst_23 = arith.constant dense<0.000000e+00> : vector<2x8x8xf32>
    %63 = tpu.matmul %56, %59, %cst_23 {dimension_numbers = #tpu.dot_dimension_numbers<[2], [2], [1], [1], [0, 0, 0, 1, 1, 1], [0], [0]>} : vector<2x8x16xbf16>, vector<2x8x16xbf16>, vector<2x8x8xf32> -> vector<2x8x8xf32>
    "tpu.trace_stop"() : () -> ()
    %64 = vector.shape_cast %53 : vector<8x8xf32> to vector<1x8x8xf32>
    %65 = vector.broadcast %64 : vector<1x8x8xf32> to vector<2x8x8xf32>
    %66 = arith.addf %63, %65 : vector<2x8x8xf32>
    %cst_24 = arith.constant dense<0xFF800000> : vector<2x8xf32>
    %67 = vector.multi_reduction <maximumf>, %66, %cst_24 [2] : vector<2x8x8xf32> to vector<2x8xf32>
    %68 = vector.shape_cast %67 : vector<2x8xf32> to vector<2x8x1xf32>
    %69 = vector.broadcast %68 : vector<2x8x1xf32> to vector<2x8x8xf32>
    %70 = arith.subf %66, %69 : vector<2x8x8xf32>
    %71 = math.exp %70 : vector<2x8x8xf32>
    %cst_25 = arith.constant dense<0.000000e+00> : vector<2x8xf32>
    %72 = vector.multi_reduction <add>, %71, %cst_25 [2] : vector<2x8x8xf32> to vector<2x8xf32>
    %73 = vector.shape_cast %72 : vector<2x8xf32> to vector<2x8x1xf32>
    %74 = tpu.reciprocal %73 {approx = true} : vector<2x8x1xf32> -> vector<2x8x1xf32>
    %75 = vector.broadcast %74 : vector<2x8x1xf32> to vector<2x8x8xf32>
    %76 = arith.mulf %71, %75 : vector<2x8x8xf32>
    %77 = arith.truncf %76 : vector<2x8x8xf32> to vector<2x8x8xbf16>
    "tpu.trace_start"() <{level = 10 : i32, message = "bqk,bkd->bqd"}> : () -> ()
    %cst_26 = arith.constant dense<0.000000e+00> : vector<2x8x16xf32>
    %78 = tpu.matmul %77, %62, %cst_26 {dimension_numbers = #tpu.dot_dimension_numbers<[2], [1], [1], [2], [0, 0, 0, 1, 1, 2], [0], [0]>} : vector<2x8x8xbf16>, vector<2x8x16xbf16>, vector<2x8x16xf32> -> vector<2x8x16xf32>
    "tpu.trace_stop"() : () -> ()
    %79 = vector.shape_cast %78 : vector<2x8x16xf32> to vector<16x16xf32>
    %80 = vector.extract_strided_slice %42 {offsets = [0, 16], sizes = [16, 16], strides = [1, 1]} : vector<16x64xf32> to vector<16x16xf32>
    %81 = vector.shape_cast %80 : vector<16x16xf32> to vector<2x8x16xf32>
    %82 = arith.truncf %81 : vector<2x8x16xf32> to vector<2x8x16xbf16>
    %83 = vector.extract_strided_slice %47 {offsets = [0, 16], sizes = [16, 16], strides = [1, 1]} : vector<16x64xf32> to vector<16x16xf32>
    %84 = vector.shape_cast %83 : vector<16x16xf32> to vector<2x8x16xf32>
    %85 = arith.truncf %84 : vector<2x8x16xf32> to vector<2x8x16xbf16>
    %86 = vector.extract_strided_slice %52 {offsets = [0, 16], sizes = [16, 16], strides = [1, 1]} : vector<16x64xf32> to vector<16x16xf32>
    %87 = vector.shape_cast %86 : vector<16x16xf32> to vector<2x8x16xf32>
    %88 = arith.truncf %87 : vector<2x8x16xf32> to vector<2x8x16xbf16>
    "tpu.trace_start"() <{level = 10 : i32, message = "bqd,bkd->bqk"}> : () -> ()
    %cst_27 = arith.constant dense<0.000000e+00> : vector<2x8x8xf32>
    %89 = tpu.matmul %82, %85, %cst_27 {dimension_numbers = #tpu.dot_dimension_numbers<[2], [2], [1], [1], [0, 0, 0, 1, 1, 1], [0], [0]>} : vector<2x8x16xbf16>, vector<2x8x16xbf16>, vector<2x8x8xf32> -> vector<2x8x8xf32>
    "tpu.trace_stop"() : () -> ()
    %90 = vector.shape_cast %53 : vector<8x8xf32> to vector<1x8x8xf32>
    %91 = vector.broadcast %90 : vector<1x8x8xf32> to vector<2x8x8xf32>
    %92 = arith.addf %89, %91 : vector<2x8x8xf32>
    %cst_28 = arith.constant dense<0xFF800000> : vector<2x8xf32>
    %93 = vector.multi_reduction <maximumf>, %92, %cst_28 [2] : vector<2x8x8xf32> to vector<2x8xf32>
    %94 = vector.shape_cast %93 : vector<2x8xf32> to vector<2x8x1xf32>
    %95 = vector.broadcast %94 : vector<2x8x1xf32> to vector<2x8x8xf32>
    %96 = arith.subf %92, %95 : vector<2x8x8xf32>
    %97 = math.exp %96 : vector<2x8x8xf32>
    %cst_29 = arith.constant dense<0.000000e+00> : vector<2x8xf32>
    %98 = vector.multi_reduction <add>, %97, %cst_29 [2] : vector<2x8x8xf32> to vector<2x8xf32>
    %99 = vector.shape_cast %98 : vector<2x8xf32> to vector<2x8x1xf32>
    %100 = tpu.reciprocal %99 {approx = true} : vector<2x8x1xf32> -> vector<2x8x1xf32>
    %101 = vector.broadcast %100 : vector<2x8x1xf32> to vector<2x8x8xf32>
    %102 = arith.mulf %97, %101 : vector<2x8x8xf32>
    %103 = arith.truncf %102 : vector<2x8x8xf32> to vector<2x8x8xbf16>
    "tpu.trace_start"() <{level = 10 : i32, message = "bqk,bkd->bqd"}> : () -> ()
    %cst_30 = arith.constant dense<0.000000e+00> : vector<2x8x16xf32>
    %104 = tpu.matmul %103, %88, %cst_30 {dimension_numbers = #tpu.dot_dimension_numbers<[2], [1], [1], [2], [0, 0, 0, 1, 1, 2], [0], [0]>} : vector<2x8x8xbf16>, vector<2x8x16xbf16>, vector<2x8x16xf32> -> vector<2x8x16xf32>
    "tpu.trace_stop"() : () -> ()
    %105 = vector.shape_cast %104 : vector<2x8x16xf32> to vector<16x16xf32>
    %106 = vector.extract_strided_slice %42 {offsets = [0, 32], sizes = [16, 16], strides = [1, 1]} : vector<16x64xf32> to vector<16x16xf32>
    %107 = vector.shape_cast %106 : vector<16x16xf32> to vector<2x8x16xf32>
    %108 = arith.truncf %107 : vector<2x8x16xf32> to vector<2x8x16xbf16>
    %109 = vector.extract_strided_slice %47 {offsets = [0, 32], sizes = [16, 16], strides = [1, 1]} : vector<16x64xf32> to vector<16x16xf32>
    %110 = vector.shape_cast %109 : vector<16x16xf32> to vector<2x8x16xf32>
    %111 = arith.truncf %110 : vector<2x8x16xf32> to vector<2x8x16xbf16>
    %112 = vector.extract_strided_slice %52 {offsets = [0, 32], sizes = [16, 16], strides = [1, 1]} : vector<16x64xf32> to vector<16x16xf32>
    %113 = vector.shape_cast %112 : vector<16x16xf32> to vector<2x8x16xf32>
    %114 = arith.truncf %113 : vector<2x8x16xf32> to vector<2x8x16xbf16>
    "tpu.trace_start"() <{level = 10 : i32, message = "bqd,bkd->bqk"}> : () -> ()
    %cst_31 = arith.constant dense<0.000000e+00> : vector<2x8x8xf32>
    %115 = tpu.matmul %108, %111, %cst_31 {dimension_numbers = #tpu.dot_dimension_numbers<[2], [2], [1], [1], [0, 0, 0, 1, 1, 1], [0], [0]>} : vector<2x8x16xbf16>, vector<2x8x16xbf16>, vector<2x8x8xf32> -> vector<2x8x8xf32>
    "tpu.trace_stop"() : () -> ()
    %116 = vector.shape_cast %53 : vector<8x8xf32> to vector<1x8x8xf32>
    %117 = vector.broadcast %116 : vector<1x8x8xf32> to vector<2x8x8xf32>
    %118 = arith.addf %115, %117 : vector<2x8x8xf32>
    %cst_32 = arith.constant dense<0xFF800000> : vector<2x8xf32>
    %119 = vector.multi_reduction <maximumf>, %118, %cst_32 [2] : vector<2x8x8xf32> to vector<2x8xf32>
    %120 = vector.shape_cast %119 : vector<2x8xf32> to vector<2x8x1xf32>
    %121 = vector.broadcast %120 : vector<2x8x1xf32> to vector<2x8x8xf32>
    %122 = arith.subf %118, %121 : vector<2x8x8xf32>
    %123 = math.exp %122 : vector<2x8x8xf32>
    %cst_33 = arith.constant dense<0.000000e+00> : vector<2x8xf32>
    %124 = vector.multi_reduction <add>, %123, %cst_33 [2] : vector<2x8x8xf32> to vector<2x8xf32>
    %125 = vector.shape_cast %124 : vector<2x8xf32> to vector<2x8x1xf32>
    %126 = tpu.reciprocal %125 {approx = true} : vector<2x8x1xf32> -> vector<2x8x1xf32>
    %127 = vector.broadcast %126 : vector<2x8x1xf32> to vector<2x8x8xf32>
    %128 = arith.mulf %123, %127 : vector<2x8x8xf32>
    %129 = arith.truncf %128 : vector<2x8x8xf32> to vector<2x8x8xbf16>
    "tpu.trace_start"() <{level = 10 : i32, message = "bqk,bkd->bqd"}> : () -> ()
    %cst_34 = arith.constant dense<0.000000e+00> : vector<2x8x16xf32>
    %130 = tpu.matmul %129, %114, %cst_34 {dimension_numbers = #tpu.dot_dimension_numbers<[2], [1], [1], [2], [0, 0, 0, 1, 1, 2], [0], [0]>} : vector<2x8x8xbf16>, vector<2x8x16xbf16>, vector<2x8x16xf32> -> vector<2x8x16xf32>
    "tpu.trace_stop"() : () -> ()
    %131 = vector.shape_cast %130 : vector<2x8x16xf32> to vector<16x16xf32>
    %132 = vector.extract_strided_slice %42 {offsets = [0, 48], sizes = [16, 16], strides = [1, 1]} : vector<16x64xf32> to vector<16x16xf32>
    %133 = vector.shape_cast %132 : vector<16x16xf32> to vector<2x8x16xf32>
    %134 = arith.truncf %133 : vector<2x8x16xf32> to vector<2x8x16xbf16>
    %135 = vector.extract_strided_slice %47 {offsets = [0, 48], sizes = [16, 16], strides = [1, 1]} : vector<16x64xf32> to vector<16x16xf32>
    %136 = vector.shape_cast %135 : vector<16x16xf32> to vector<2x8x16xf32>
    %137 = arith.truncf %136 : vector<2x8x16xf32> to vector<2x8x16xbf16>
    %138 = vector.extract_strided_slice %52 {offsets = [0, 48], sizes = [16, 16], strides = [1, 1]} : vector<16x64xf32> to vector<16x16xf32>
    %139 = vector.shape_cast %138 : vector<16x16xf32> to vector<2x8x16xf32>
    %140 = arith.truncf %139 : vector<2x8x16xf32> to vector<2x8x16xbf16>
    "tpu.trace_start"() <{level = 10 : i32, message = "bqd,bkd->bqk"}> : () -> ()
    %cst_35 = arith.constant dense<0.000000e+00> : vector<2x8x8xf32>
    %141 = tpu.matmul %134, %137, %cst_35 {dimension_numbers = #tpu.dot_dimension_numbers<[2], [2], [1], [1], [0, 0, 0, 1, 1, 1], [0], [0]>} : vector<2x8x16xbf16>, vector<2x8x16xbf16>, vector<2x8x8xf32> -> vector<2x8x8xf32>
    "tpu.trace_stop"() : () -> ()
    %142 = vector.shape_cast %53 : vector<8x8xf32> to vector<1x8x8xf32>
    %143 = vector.broadcast %142 : vector<1x8x8xf32> to vector<2x8x8xf32>
    %144 = arith.addf %141, %143 : vector<2x8x8xf32>
    %cst_36 = arith.constant dense<0xFF800000> : vector<2x8xf32>
    %145 = vector.multi_reduction <maximumf>, %144, %cst_36 [2] : vector<2x8x8xf32> to vector<2x8xf32>
    %146 = vector.shape_cast %145 : vector<2x8xf32> to vector<2x8x1xf32>
    %147 = vector.broadcast %146 : vector<2x8x1xf32> to vector<2x8x8xf32>
    %148 = arith.subf %144, %147 : vector<2x8x8xf32>
    %149 = math.exp %148 : vector<2x8x8xf32>
    %cst_37 = arith.constant dense<0.000000e+00> : vector<2x8xf32>
    %150 = vector.multi_reduction <add>, %149, %cst_37 [2] : vector<2x8x8xf32> to vector<2x8xf32>
    %151 = vector.shape_cast %150 : vector<2x8xf32> to vector<2x8x1xf32>
    %152 = tpu.reciprocal %151 {approx = true} : vector<2x8x1xf32> -> vector<2x8x1xf32>
    %153 = vector.broadcast %152 : vector<2x8x1xf32> to vector<2x8x8xf32>
    %154 = arith.mulf %149, %153 : vector<2x8x8xf32>
    %155 = arith.truncf %154 : vector<2x8x8xf32> to vector<2x8x8xbf16>
    "tpu.trace_start"() <{level = 10 : i32, message = "bqk,bkd->bqd"}> : () -> ()
    %cst_38 = arith.constant dense<0.000000e+00> : vector<2x8x16xf32>
    %156 = tpu.matmul %155, %140, %cst_38 {dimension_numbers = #tpu.dot_dimension_numbers<[2], [1], [1], [2], [0, 0, 0, 1, 1, 2], [0], [0]>} : vector<2x8x8xbf16>, vector<2x8x16xbf16>, vector<2x8x16xf32> -> vector<2x8x16xf32>
    "tpu.trace_stop"() : () -> ()
    %157 = vector.shape_cast %156 : vector<2x8x16xf32> to vector<16x16xf32>
    %158 = tpu.concatenate %79, %105, %131, %157 in 1 : vector<16x16xf32>, vector<16x16xf32>, vector<16x16xf32>, vector<16x16xf32> -> vector<16x64xf32>
    %159 = arith.truncf %158 : vector<16x64xf32> to vector<16x64xbf16>
    %c0_39 = arith.constant 0 : index
    %c0_40 = arith.constant 0 : index
    %c0_41 = arith.constant 0 : index
    %160 = vector.load %arg8[%c0_39, %c0_40, %c0_41] : memref<1x64x64xbf16, #tpu.memory_space<vmem>>, vector<1x64x64xbf16>
    %161 = vector.shape_cast %160 : vector<1x64x64xbf16> to vector<64x64xbf16>
    %cst_42 = arith.constant dense<0.000000e+00> : vector<16x64xf32>
    %162 = tpu.matmul %159, %161, %cst_42 {dimension_numbers = #tpu.dot_dimension_numbers<[1], [0], [0], [1], [0, 0, 1, 1], [], []>} : vector<16x64xbf16>, vector<64x64xbf16>, vector<16x64xf32> -> vector<16x64xf32>
    %163 = arith.addf %3, %162 : vector<16x64xf32>
    %164 = vector.broadcast %11 : vector<1x64xf32> to vector<16x64xf32>
    %165 = arith.addf %163, %164 : vector<16x64xf32>
    %c0_43 = arith.constant 0 : index
    %c0_44 = arith.constant 0 : index
    %166 = vector.load %arg13[%c0_43, %c0_44] : memref<16x64xf32, #tpu.memory_space<vmem>>, vector<16x64xf32>
    tpu.vector_store %arg13[%c0_43, %c0_44], %165 {strides = array<i32>} : memref<16x64xf32, #tpu.memory_space<vmem>>, vector<16x64xf32>,
    %c0_45 = arith.constant 0 : index
    %c0_46 = arith.constant 0 : index
    %c0_47 = arith.constant 0 : index
    %167 = vector.load %arg10[%c0_45, %c0_46, %c0_47] : memref<1x1x256xf32, #tpu.memory_space<vmem>>, vector<1x1x256xf32>
    %168 = vector.shape_cast %167 : vector<1x1x256xf32> to vector<1x256xf32>
    %c0_i32_48 = arith.constant 0 : i32
    %c2_i32 = arith.constant 2 : i32
    %169 = arith.addi %c0_i32_48, %c2_i32 : i32
    %c1_i32 = arith.constant 1 : i32
    scf.for %arg14 = %c0_i32_48 to %169 step %c1_i32  : i32 {
      %c8_i32 = arith.constant 8 : i32
      %173 = arith.muli %arg14, %c8_i32 : i32
      %174 = tpu.assume_multiple %173, 8 : i32
      %175 = arith.index_cast %174 : i32 to index
      %c0_52 = arith.constant 0 : index
      %176 = vector.load %arg13[%175, %c0_52] : memref<16x64xf32, #tpu.memory_space<vmem>>, vector<8x64xf32>
      %cst_53 = arith.constant dense<0.000000e+00> : vector<8xf32>
      %177 = vector.multi_reduction <add>, %176, %cst_53 [1] : vector<8x64xf32> to vector<8xf32>
      %178 = vector.shape_cast %177 : vector<8xf32> to vector<8x1xf32>
      %cst_54 = arith.constant 6.400000e+01 : f32
      %179 = vector.broadcast %cst_54 : f32 to vector<8x1xf32>
      %180 = arith.divf %178, %179 : vector<8x1xf32>
      %181 = vector.broadcast %180 : vector<8x1xf32> to vector<8x64xf32>
      %182 = arith.subf %176, %181 : vector<8x64xf32>
      %183 = arith.mulf %182, %182 : vector<8x64xf32>
      %cst_55 = arith.constant dense<0.000000e+00> : vector<8xf32>
      %184 = vector.multi_reduction <add>, %183, %cst_55 [1] : vector<8x64xf32> to vector<8xf32>
      %185 = vector.shape_cast %184 : vector<8xf32> to vector<8x1xf32>
      %cst_56 = arith.constant 6.400000e+01 : f32
      %186 = vector.broadcast %cst_56 : f32 to vector<8x1xf32>
      %187 = arith.divf %185, %186 : vector<8x1xf32>
      %188 = vector.broadcast %180 : vector<8x1xf32> to vector<8x64xf32>
      %189 = arith.subf %176, %188 : vector<8x64xf32>
      %cst_57 = arith.constant 9.99999974E-6 : f32
      %190 = vector.broadcast %cst_57 : f32 to vector<8x1xf32>
      %191 = arith.addf %187, %190 : vector<8x1xf32>
      %192 = math.rsqrt %191 : vector<8x1xf32>
      %193 = vector.broadcast %192 : vector<8x1xf32> to vector<8x64xf32>
      %194 = arith.mulf %189, %193 : vector<8x64xf32>
      %195 = vector.broadcast %12 : vector<1x64xf32> to vector<8x64xf32>
      %196 = arith.mulf %194, %195 : vector<8x64xf32>
      %197 = vector.broadcast %13 : vector<1x64xf32> to vector<8x64xf32>
      %198 = arith.addf %196, %197 : vector<8x64xf32>
      %199 = arith.truncf %198 : vector<8x64xf32> to vector<8x64xbf16>
      %c0_58 = arith.constant 0 : index
      %c0_59 = arith.constant 0 : index
      %c0_60 = arith.constant 0 : index
      %200 = vector.load %arg9[%c0_58, %c0_59, %c0_60] : memref<1x64x256xbf16, #tpu.memory_space<vmem>>, vector<1x64x256xbf16>
      %201 = vector.shape_cast %200 : vector<1x64x256xbf16> to vector<64x256xbf16>
      %cst_61 = arith.constant dense<0.000000e+00> : vector<8x256xf32>
      %202 = tpu.matmul %199, %201, %cst_61 {dimension_numbers = #tpu.dot_dimension_numbers<[1], [0], [0], [1], [0, 0, 1, 1], [], []>} : vector<8x64xbf16>, vector<64x256xbf16>, vector<8x256xf32> -> vector<8x256xf32>
      %203 = vector.broadcast %168 : vector<1x256xf32> to vector<8x256xf32>
      %204 = arith.addf %202, %203 : vector<8x256xf32>
      %cst_62 = arith.constant 1.702000e+00 : f32
      %205 = vector.broadcast %cst_62 : f32 to vector<8x256xf32>
      %206 = arith.mulf %205, %204 : vector<8x256xf32>
      %207 = arith.negf %206 : vector<8x256xf32>
      %208 = math.exp %207 : vector<8x256xf32>
      %cst_63 = arith.constant 1.000000e+00 : f32
      %209 = vector.broadcast %cst_63 : f32 to vector<8x256xf32>
      %210 = arith.addf %209, %208 : vector<8x256xf32>
      %211 = arith.divf %209, %210 : vector<8x256xf32>
      %212 = arith.mulf %204, %211 : vector<8x256xf32>
      %213 = arith.truncf %212 : vector<8x256xf32> to vector<8x256xbf16>
      %c0_64 = arith.constant 0 : index
      %c0_65 = arith.constant 0 : index
      %c0_66 = arith.constant 0 : index
      %214 = vector.load %arg11[%c0_64, %c0_65, %c0_66] : memref<1x256x64xbf16, #tpu.memory_space<vmem>>, vector<1x256x64xbf16>
      %215 = vector.shape_cast %214 : vector<1x256x64xbf16> to vector<256x64xbf16>
      %cst_67 = arith.constant dense<0.000000e+00> : vector<8x64xf32>
      %216 = tpu.matmul %213, %215, %cst_67 {dimension_numbers = #tpu.dot_dimension_numbers<[1], [0], [0], [1], [0, 0, 1, 1], [], []>} : vector<8x256xbf16>, vector<256x64xbf16>, vector<8x64xf32> -> vector<8x64xf32>
      %217 = vector.broadcast %14 : vector<1x64xf32> to vector<8x64xf32>
      %218 = arith.addf %216, %217 : vector<8x64xf32>
      %219 = arith.addf %176, %218 : vector<8x64xf32>
      %220 = arith.index_cast %174 : i32 to index
      %c0_68 = arith.constant 0 : index
      %221 = vector.load %arg13[%220, %c0_68] : memref<16x64xf32, #tpu.memory_space<vmem>>, vector<8x64xf32>
      tpu.vector_store %arg13[%220, %c0_68], %219 {strides = array<i32>} : memref<16x64xf32, #tpu.memory_space<vmem>>, vector<8x64xf32>,
    }
    %c2_i32_49 = arith.constant 2 : i32
    %c1_i32_50 = arith.constant 1 : i32
    %170 = arith.cmpi eq, %arg1, %c1_i32_50 : i32
    %171 = arith.extui %170 : i1 to i32
    %c0_i32_51 = arith.constant 0 : i32
    %172 = arith.cmpi ne, %171, %c0_i32_51 : i32
    scf.if %172 {
      %c0_52 = arith.constant 0 : index
      %c0_53 = arith.constant 0 : index
      %173 = vector.load %arg12[%c0_52, %c0_53] : memref<2x64xf32, #tpu.memory_space<vmem>>, vector<2x64xf32>
      %c0_54 = arith.constant 0 : index
      %c0_55 = arith.constant 0 : index
      %174 = vector.load %arg13[%c0_54, %c0_55] : memref<16x64xf32, #tpu.memory_space<vmem>>, vector<16x64xf32>
      %175 = vector.extract_strided_slice %173 {offsets = [0, 0], sizes = [1, 64], strides = [1, 1]} : vector<2x64xf32> to vector<1x64xf32>
      %176 = vector.extract_strided_slice %173 {offsets = [1, 0], sizes = [1, 64], strides = [1, 1]} : vector<2x64xf32> to vector<1x64xf32>
      %cst_56 = arith.constant dense<0.000000e+00> : vector<16xf32>
      %177 = vector.multi_reduction <add>, %174, %cst_56 [1] : vector<16x64xf32> to vector<16xf32>
      %178 = vector.shape_cast %177 : vector<16xf32> to vector<16x1xf32>
      %cst_57 = arith.constant 6.400000e+01 : f32
      %179 = vector.broadcast %cst_57 : f32 to vector<16x1xf32>
      %180 = arith.divf %178, %179 : vector<16x1xf32>
      %181 = vector.broadcast %180 : vector<16x1xf32> to vector<16x64xf32>
      %182 = arith.subf %174, %181 : vector<16x64xf32>
      %183 = arith.mulf %182, %182 : vector<16x64xf32>
      %cst_58 = arith.constant dense<0.000000e+00> : vector<16xf32>
      %184 = vector.multi_reduction <add>, %183, %cst_58 [1] : vector<16x64xf32> to vector<16xf32>
      %185 = vector.shape_cast %184 : vector<16xf32> to vector<16x1xf32>
      %cst_59 = arith.constant 6.400000e+01 : f32
      %186 = vector.broadcast %cst_59 : f32 to vector<16x1xf32>
      %187 = arith.divf %185, %186 : vector<16x1xf32>
      %188 = vector.broadcast %180 : vector<16x1xf32> to vector<16x64xf32>
      %189 = arith.subf %174, %188 : vector<16x64xf32>
      %cst_60 = arith.constant 9.99999974E-6 : f32
      %190 = vector.broadcast %cst_60 : f32 to vector<16x1xf32>
      %191 = arith.addf %187, %190 : vector<16x1xf32>
      %192 = math.rsqrt %191 : vector<16x1xf32>
      %193 = vector.broadcast %192 : vector<16x1xf32> to vector<16x64xf32>
      %194 = arith.mulf %189, %193 : vector<16x64xf32>
      %195 = vector.broadcast %175 : vector<1x64xf32> to vector<16x64xf32>
      %196 = arith.mulf %194, %195 : vector<16x64xf32>
      %197 = vector.broadcast %176 : vector<1x64xf32> to vector<16x64xf32>
      %198 = arith.addf %196, %197 : vector<16x64xf32>
      %c0_61 = arith.constant 0 : index
      %c0_62 = arith.constant 0 : index
      %199 = vector.load %arg13[%c0_61, %c0_62] : memref<16x64xf32, #tpu.memory_space<vmem>>, vector<16x64xf32>
      tpu.vector_store %arg13[%c0_61, %c0_62], %198 {strides = array<i32>} : memref<16x64xf32, #tpu.memory_space<vmem>>, vector<16x64xf32>,
    } else {
    }
    return
  }
  func.func @transform_0(%arg0: i32, %arg1: i32) -> (i32, i32) {
    %c0_i32 = arith.constant 0 : i32
    %c0_i32_0 = arith.constant 0 : i32
    return %arg0, %c0_i32 : i32, i32
  }
  func.func @transform_1(%arg0: i32, %arg1: i32) -> (i32, i32) {
    %c0_i32 = arith.constant 0 : i32
    %c0_i32_0 = arith.constant 0 : i32
    %c0_i32_1 = arith.constant 0 : i32
    return %c0_i32, %c0_i32_0 : i32, i32
  }
  func.func @transform_2(%arg0: i32, %arg1: i32) -> (i32, i32, i32) {
    %c0_i32 = arith.constant 0 : i32
    %c0_i32_0 = arith.constant 0 : i32
    %c0_i32_1 = arith.constant 0 : i32
    return %arg1, %c0_i32, %c0_i32_0 : i32, i32, i32
  }
  func.func @transform_3(%arg0: i32, %arg1: i32) -> (i32, i32, i32) {
    %c0_i32 = arith.constant 0 : i32
    %c0_i32_0 = arith.constant 0 : i32
    %c0_i32_1 = arith.constant 0 : i32
    return %arg1, %c0_i32, %c0_i32_0 : i32, i32, i32
  }
  func.func @transform_4(%arg0: i32, %arg1: i32) -> (i32, i32, i32) {
    %c0_i32 = arith.constant 0 : i32
    %c0_i32_0 = arith.constant 0 : i32
    %c0_i32_1 = arith.constant 0 : i32
    return %arg1, %c0_i32, %c0_i32_0 : i32, i32, i32
  }
  func.func @transform_5(%arg0: i32, %arg1: i32) -> (i32, i32, i32) {
    %c0_i32 = arith.constant 0 : i32
    %c0_i32_0 = arith.constant 0 : i32
    %c0_i32_1 = arith.constant 0 : i32
    return %arg1, %c0_i32, %c0_i32_0 : i32, i32, i32
  }
  func.func @transform_6(%arg0: i32, %arg1: i32) -> (i32, i32, i32) {
    %c0_i32 = arith.constant 0 : i32
    %c0_i32_0 = arith.constant 0 : i32
    %c0_i32_1 = arith.constant 0 : i32
    return %arg1, %c0_i32, %c0_i32_0 : i32, i32, i32
  }
  func.func @transform_7(%arg0: i32, %arg1: i32) -> (i32, i32, i32) {
    %c0_i32 = arith.constant 0 : i32
    %c0_i32_0 = arith.constant 0 : i32
    %c0_i32_1 = arith.constant 0 : i32
    return %arg1, %c0_i32, %c0_i32_0 : i32, i32, i32
  }
  func.func @transform_8(%arg0: i32, %arg1: i32) -> (i32, i32, i32) {
    %c0_i32 = arith.constant 0 : i32
    %c0_i32_0 = arith.constant 0 : i32
    %c0_i32_1 = arith.constant 0 : i32
    return %arg1, %c0_i32, %c0_i32_0 : i32, i32, i32
  }
  func.func @transform_9(%arg0: i32, %arg1: i32) -> (i32, i32, i32) {
    %c0_i32 = arith.constant 0 : i32
    %c0_i32_0 = arith.constant 0 : i32
    %c0_i32_1 = arith.constant 0 : i32
    return %arg1, %c0_i32, %c0_i32_0 : i32, i32, i32
  }
  func.func @transform_10(%arg0: i32, %arg1: i32) -> (i32, i32) {
    %c0_i32 = arith.constant 0 : i32
    %c0_i32_0 = arith.constant 0 : i32
    %c0_i32_1 = arith.constant 0 : i32
    return %c0_i32, %c0_i32_0 : i32, i32
  }
  func.func @transform_11(%arg0: i32, %arg1: i32) -> (i32, i32) {
    %c0_i32 = arith.constant 0 : i32
    %c0_i32_0 = arith.constant 0 : i32
    return %arg0, %c0_i32 : i32, i32
  }
}

</mosaic_0001>

<bundles_post_ra>
// kernel: frozen_clip_embedder.1
= control target key start
LH: loop header
LB: loop body
LE: loop exit
PB: predicated region body
PF: predicated region fallthrough
CT: control target
= control target key end

     0   :  { %s2376_s17 = smov 0   ;;  %s2378_s18 = smov 0   ;;  %s2723_s0 = inlined_call_operand.vmem [shape: f32[32,64], index: 0, kind: input, shape index: {}]   ;;  %s2724_s1 = inlined_call_operand.vmem [shape: f32[8,8], index: 1, kind: input, shape index: {}]   ;;  %s2725_s2 = inlined_call_operand.vmem [shape: f32[2,9,64], index: 2, kind: input, shape index: {}]   ;;  %s2726_s3 = inlined_call_operand.vmem [shape: bf16[2,64,64], index: 3, kind: input, shape index: {}]   ;;  %s2727_s4 = inlined_call_operand.vmem [shape: bf16[2,64,64], index: 4, kind: input, shape index: {}]   ;;  %s2728_s5 = inlined_call_operand.vmem [shape: bf16[2,64,64], index: 5, kind: input, shape index: {}]   ;;  %s2729_s6 = inlined_call_operand.vmem [shape: bf16[2,64,64], index: 6, kind: input, shape index: {}]   ;;  %s2730_s7 = inlined_call_operand.vmem [shape: bf16[2,64,256], index: 7, kind: input, shape index: {}]   ;;  %s2731_s8 = inlined_call_operand.vmem [shape: f32[2,1,256], index: 8, kind: input, shape index: {}]   ;;  %s2732_s9 = inlined_call_operand.vmem [shape: bf16[2,256,64], index: 9, kind: input, shape index: {}]   ;;  %s2733_s10 = inlined_call_operand.vmem [shape: f32[2,64], index: 10, kind: input, shape index: {}]   ;;  %s2734_s11 = inlined_call_operand.vmem [shape: f32[32,64], index: 11, kind: output, shape index: {}]  }
   0x1   :  { %2738 = sst [smem:[#allocation7_spill]] %s2723_s0  ;;  %s2380_s19 = smov 0  }
   0x2   :  { %2739 = sst [smem:[#allocation8_spill]] %s2725_s2  ;;  %s2382_s20 = smov 0  }
   0x3   :  { %2740 = sst [smem:[#allocation9_spill]] %s2726_s3  ;;  %s2384_s21 = smov 0  }
   0x4   :  { %2741 = sst [smem:[#allocation10_spill]] %s2727_s4 }
   0x5   :  { %2742 = sst [smem:[#allocation11_spill]] %s2728_s5 }
   0x6 LB: > { %2743 = sst [smem:[#allocation2_spill]] %s2295_s19  ;;  %s30_s22 = sadd.s32 1, %s2295_s19  ;;  %s2303_s21 = sphi %s2384_s21, %s21_s21   ;;  %s2299_s20 = sphi %s2382_s20, %s2757_s20   ;;  %s2295_s19 = sphi %s2380_s19, %s2756_s19   ;;  %s2291_s18 = sphi %s2378_s18, %s2755_s18   ;;  %s2287_s17 = sphi %s2376_s17, %s2754_s17  }
   0x7   : > { %2744 = sst [smem:[#allocation3_spill]] %s2299_s20  ;;  %s33_s23 = sadd.s32 1, %s2299_s20 }
   0x8   : > { %2745 = sst [smem:[#allocation4_spill]] %s2303_s21  ;;  %p31_p0 = scmp.ge.s32.totalorder %s30_s22, 2 }
   0x9   : > { %p1883_p1 = scmp.ge.s32.totalorder %s2303_s21, 1  ;;  %p429_p2 = scmp.lt.s32.totalorder %s2303_s21, 5 }
   0xa   : > { %s2759_s22 = smov (%p31_p0, %s30_s22), 0  ;;  %s2761_s23 = smov (!%p31_p0, %s33_s23), %s2299_s20 }
   0xb   : > { %2746 = sst [smem:[#allocation5_spill]] %s2759_s22  ;;  %p430_p3 = pnand %p1883_p1, %p429_p2 }
   0xc   : > { %p35_p4 = scmp.ge.s32.totalorder %s2761_s23, 2  ;;  %s1884_s24 = sshll.u32 (!%p430_p3), %s2291_s18, 1 }
   0xd   : > { %433 = sbr.rel (%p430_p3) target bundleno = 2270 (0x8de), region = 64  ;;  %p514_p5 = scmp.lt.s32.totalorder (!%p430_p3), %s2287_s17, 1 }
   0xe   : > { %s2763_s23 = smov (%p35_p4, %s2761_s23), 0  ;;  %p509_p6 = scmp.lt.s32.totalorder (!%p430_p3), %s1884_s24, 3 }
   0xf   : > { %2747 = sst [smem:[#allocation6_spill]] %s2763_s23  ;;  %p1903_p7 = scmp.ne.s32.totalorder (!%p430_p3), %s2287_s17, 0 }
  0x10   : > { %s2748_s2 = sld [smem:[#allocation8_spill]] (!%p430_p3) }
  0x11   : > { %s2749_s0 = sld [smem:[#allocation7_spill]] (!%p430_p3) }
  0x12   : > { %s515_s25 = scalar_select %p514_p5, %s2287_s17, 1 }
  0x13   : > { %s2765_s24 = smov (!%p509_p6, %s1884_s24), 3  ;;  %s2750_s3 = sld [smem:[#allocation9_spill]] }
  0x14   : > { %s2092_s26 = sshll.u32 %s515_s25, 4  ;;  %s2093_s27 = sshll.u32 %s515_s25, 5 }
  0x15   : > { %s1885_s28 = sshll.u32 %s2765_s24, 3  ;;  %s2751_s4 = sld [smem:[#allocation10_spill]] }
  0x16   : > { %s2413_s12 = scalar_lea.vmem %s2748_s2, %s2092_s26  ;;  %s2752_s5 = sld [smem:[#allocation11_spill]] }
  0x17   : > { %s512_s15 = scalar_lea.vmem %s2749_s0, %s1885_s28  ;;  %s2436_s13 = scalar_lea.vmem %s2729_s6, %s2093_s27 }
  0x18   : > { %s2097_s14 = sshll.u32 %s515_s25, 6  ;;  %s1898_s2 = sshll.u32 %s515_s25, 1 }
  0x19   : > { %s2421_s23 = scalar_lea.vmem %s2750_s3, %s2093_s27  ;;  %s2441_s18 = scalar_lea.vmem %s2730_s7, %s2097_s14 }
  0x1a   : > { %s2446_s3 = scalar_lea.vmem %s2731_s8, %s1898_s2  ;;  %s2098_s21 = sshll.u32 %s515_s25, 7 }
  0x1b   : > { %s2426_s19 = scalar_lea.vmem %s2751_s4, %s2093_s27  ;;  %s2456_s30 = scalar_lea.vmem %s2734_s11, %s1885_s28 }
  0x1c   : > { %s2431_s29 = scalar_lea.vmem %s2752_s5, %s2093_s27  ;;  %s2451_s5 = scalar_lea.vmem %s2732_s9, %s2098_s21 }
  0x1d   : > { %563 = sbr.rel (%p1903_p7) target bundleno = 37 (0x25), region = 68 }
  0x22   : > { %v564_v0 = vld [vmem:[%s512_s15] sm:$0xff]  ;;  %vm566_vm0 = vcmask 523264   ;;  %v565_v1 = vld [vmem:[%s512_s15 + $0x8] sm:$0xff] }
  0x23   : > { %567 = vst.msk [vmem:[%s2456_s30] sm:$0xff] %vm566_vm0, %v564_v0 }
  0x24   : > { %568 = vst.msk [vmem:[%s2456_s30 + $0x8] sm:$0xff] %vm566_vm0, %v565_v1 }
  0x25 PF: > { %vm573_vm1 = vcmask 523264   ;;  %v2309_v6 = vmov 64.0   ;;  %v2102_v23 = vld [vmem:[%s2421_s23 + $0x18] sm:$0xff]  ;;  %v2101_v26 = vld [vmem:[%s2421_s23 + $0x10] sm:$0xff]  ;;  %v2100_v29 = vld [vmem:[%s2421_s23 + $0x8] sm:$0xff]  ;;  %vm783_vm9 = vcmask 130048  }
  0x26   : > { %2209 = vrcp.f32 %v2309_v6  ;;  %v2106_v24 = vld [vmem:[%s2426_s19 + $0x18] sm:$0xff]  ;;  %672 = vmatpush.bf16.msra.mxu0 %v2102_v23  ;;  %v2105_v27 = vld [vmem:[%s2426_s19 + $0x10] sm:$0xff]  ;;  %v2104_v30 = vld [vmem:[%s2426_s19 + $0x8] sm:$0xff]  ;;  %s2310_s0 = smov 112   ;;  %vm850_vm10 = vcmask 1043456   ;;  %s2311_s2 = smov 96  }
  0x27   : > { %v2110_v25 = vld [vmem:[%s2431_s29 + $0x18] sm:$0xff]  ;;  %719 = vmatpush.bf16.msra.mxu1 %v2106_v24  ;;  %v2109_v28 = vld [vmem:[%s2431_s29 + $0x10] sm:$0xff]  ;;  %v2108_v31 = vld [vmem:[%s2431_s29 + $0x8] sm:$0xff]  ;;  %s2312_s4 = smov 80   ;;  %vm822_vm11 = vcmask 64512   ;;  %s2313_s25 = smov 16  }
  0x28   : > { %766 = vmatpush.bf16.msra.mxu2 %v2110_v25  ;;  %v2489_v32 = vld [vmem:[%s2413_s12 + $0x8] sm:$0x1]  ;;  %v2099_v34 = vld [vmem:[%s2421_s23] sm:$0xff]  ;;  %s2314_s28 = smov 32   ;;  %vm1266_vm12 = vcmask 261120   ;;  %vm1269_vm13 = vcmask 392192  }
  0x29   : > { %v2103_v35 = vld [vmem:[%s2426_s19] sm:$0xff]  ;;  %s2627_s15 = smov 0  }
  0x2a   : > { %v2462_v2 = vld [vmem:[%s2456_s30] sm:$0xff]  ;;  %673 = vmatpush.bf16.msra.mxu0 %v2101_v26 }
  0x2b   : > { %v574_v3 = vsel %vm573_vm1, %v2462_v2, 0.0  ;;  %v2467_v4 = vld [vmem:[%s2456_s30 + $0x8] sm:$0xff]  ;;  %720 = vmatpush.bf16.msra.mxu1 %v2105_v27  ;;  %v2107_v37 = vld [vmem:[%s2431_s29] sm:$0xff] }
  0x2c   : > { %575 = vadd.xlane.f32.xlu0 %v574_v3  ;;  %v577_v5 = vsel %vm573_vm1, %v2467_v4, 0.0  ;;  %v2210_v7 = vpop.eup %2209  ;;  %767 = vmatpush.bf16.msra.mxu2 %v2109_v28  ;;  %v2497_v53 = vld [vmem:[%s2413_s12] sm:$0xff]  ;;  %s2315_s12 = smov 48  }
  0x2d   : > { %v581_v8 = vmul.f32 64.0, %v2210_v7  ;;  %vm585_vm2 = vweird.f32 %v2210_v7  ;;  %v625_v56 = vperm.slane %v2497_v53, 0  ;;  %v628_v61 = vperm.slane %v2497_v53, 1 }
  0x2e   : > { %674 = vmatpush.bf16.msra.mxu0 %v2100_v29  ;;  %v640_v3 = vperm.slane %v2497_v53, 2 }
  0x2f   : > { %v582_v9 = vsub.f32 1.0, %v581_v8  ;;  %721 = vmatpush.bf16.msra.mxu1 %v2104_v30 }
  0x30   : > { %768 = vmatpush.bf16.msra.mxu2 %v2108_v31 }
  0x31   : > { %v583_v10 = vmul.f32 %v2210_v7, %v582_v9 }
  0x32   : > { %675 = vmatpush.bf16.msra.mxu0 %v2099_v34 }
  0x33   : > { %v584_v11 = vadd.f32 %v2210_v7, %v583_v10  ;;  %722 = vmatpush.bf16.msra.mxu1 %v2103_v35 }
  0x34   : > { %578 = vadd.xlane.f32.xlu0 %v577_v5  ;;  %769 = vmatpush.bf16.msra.mxu2 %v2107_v37  ;;  %v690_v5 = vperm.slane %v2497_v53, 3 }
  0x35   : > { %v2471_v12 = vsel %vm585_vm2, %v2210_v7, %v584_v11 }
  0x9f   : > { %v576_v13 = vpop.xlane.xlu0 %575 }
  0xa0   : > { %v587_v14 = vmul.f32 %v2471_v12, %v576_v13  ;;  %v737_v13 = vperm.slane %v2497_v53, 4 }
  0xa2   : > { %v589_v15 = vsub.f32 %v2462_v2, %v587_v14 }
  0xa4   : > { %v591_v16 = vmul.f32 %v589_v15, %v589_v15 }
  0xa6   : > { %v593_v17 = vsel %vm573_vm1, %v591_v16, 0.0 }
  0xa7   : > { %594 = vadd.xlane.f32.xlu1 %v593_v17  ;;  %v579_v18 = vpop.xlane.xlu0 %578 }
  0xa8   : > { %v588_v19 = vmul.f32 %v2471_v12, %v579_v18 }
  0xaa   : > { %v590_v20 = vsub.f32 %v2467_v4, %v588_v19 }
  0xac   : > { %v592_v21 = vmul.f32 %v590_v20, %v590_v20 }
  0xae   : > { %v596_v22 = vsel %vm573_vm1, %v592_v21, 0.0 }
  0xaf   : > { %597 = vadd.xlane.f32.xlu1 %v596_v22 }
 0x11a   : > { %v595_v33 = vpop.xlane.xlu1 %594 }
 0x11b   : > { %v599_v36 = vmul.f32 %v595_v33, %v2471_v12 }
 0x11d   : > { %v601_v38 = vadd.f32 1e-05, %v599_v36 }
 0x11f   : > { %2211 = vrsqrt.f32 %v601_v38  ;;  %vm609_vm4 = vweird.f32 %v601_v38 }
 0x122   : > { %v598_v39 = vpop.xlane.xlu1 %597 }
 0x123   : > { %v600_v40 = vmul.f32 %v598_v39, %v2471_v12 }
 0x125   : > { %v2212_v41 = vpop.eup %2211  ;;  %v602_v42 = vadd.f32 1e-05, %v600_v40 }
 0x126   : > { %v604_v43 = vmul.f32 %v2212_v41, %v601_v38  ;;  %vm610_vm3 = vweird.f32 %v2212_v41 }
 0x127   : > { %2213 = vrsqrt.f32 %v602_v42  ;;  %vm611_vm5 = vmor %vm609_vm4, %vm610_vm3  ;;  %vm619_vm7 = vweird.f32 %v602_v42 }
 0x128   : > { %v605_v44 = vmul.f32 %v2212_v41, %v604_v43 }
 0x12a   : > { %v606_v45 = vmul.f32 0.5, %v605_v44 }
 0x12c   : > { %v607_v46 = vsub.f32 1.5, %v606_v45 }
 0x12d   : > { %v2214_v47 = vpop.eup %2213 }
 0x12e   : > { %v608_v48 = vmul.f32 %v2212_v41, %v607_v46  ;;  %v614_v49 = vmul.f32 %v2214_v47, %v602_v42  ;;  %vm620_vm6 = vweird.f32 %v2214_v47 }
 0x12f   : > { %vm621_vm8 = vmor %vm619_vm7, %vm620_vm6 }
 0x130   : > { %v615_v50 = vmul.f32 %v2214_v47, %v614_v49  ;;  %v612_v51 = vsel %vm611_vm5, %v2212_v41, %v608_v48 }
 0x131   : > { %v623_v55 = vmul.f32 %v612_v51, %v589_v15 }
 0x132   : > { %v616_v52 = vmul.f32 0.5, %v615_v50 }
 0x133   : > { %v626_v60 = vmul.f32 %v625_v56, %v623_v55  ;;  %v2543_v55 = vld [vmem:[%s2724_s1] sm:$0xff] }
 0x134   : > { %v617_v54 = vsub.f32 1.5, %v616_v52 }
 0x135   : > { %v629_v63 = vadd.f32 %v628_v61, %v626_v60 }
 0x136   : > { %v618_v57 = vmul.f32 %v2214_v47, %v617_v54 }
 0x138   : > { %v622_v58 = vsel %vm621_vm8, %v2214_v47, %v618_v57 }
 0x139   : > { %v624_v59 = vmul.f32 %v622_v58, %v590_v20 }
 0x13b   : > { %v627_v62 = vmul.f32 %v625_v56, %v624_v59 }
 0x13d   : > { %v630_v0 = vadd.f32 %v628_v61, %v627_v62 }
 0x13f   : > { %v631_v1 = vpack.c.bf16 %v630_v0, %v629_v63 }
 0x141   : > { %1920 = vmatmul.msk.bf16.vlgmr.msra.gmra.mxu0 %vm573_vm1, %v631_v1  ;;  %1937 = vmatmul.msk.bf16.vlgmr.msra.gmra.mxu1 %vm573_vm1, %v631_v1 }
 0x142   : > { %1954 = vmatmul.msk.bf16.vlgmr.msra.gmra.mxu2 %vm573_vm1, %v631_v1 }
 0x1be   : > { %v677_v6 = vpop.f32.mrf.mxu0  ;;  %v724_v7 = vpop.f32.mrf.mxu1 }
 0x1bf   : > { %v678_v8 = vadd.f32 %v677_v6, %v640_v3  ;;  %v725_v9 = vadd.f32 %v724_v7, %v690_v5 }
 0x1c1   : > { %v777_v10 = vpack.c.bf16 %v678_v8, %v678_v8  ;;  %v779_v11 = vpack.c.bf16 %v725_v9, %v725_v9 }
 0x1c3   : > { %v887_v14 = vunpack.c.l.b16 %v777_v10  ;;  %v892_v15 = vunpack.c.l.b16 %v779_v11  ;;  %v788_v16 = vsel %vm783_vm9, %v779_v11, 0 }
 0x1c4   : > { %797 = vmatpush.bf16.xpose.msra.mxu3 %v788_v16 }
 0x1c5   : > { %v888_v17 = vpack.c.b16 %v887_v14, %v887_v14  ;;  %v893_v18 = vpack.c.b16 %v892_v15, %v892_v15  ;;  %v771_v19 = vpop.f32.mrf.mxu2 }
 0x1c6   : > { %v772_v20 = vadd.f32 %v771_v19, %v737_v13  ;;  %v679_v21 = vpop.f32.mrf.mxu0  ;;  %v726_v22 = vpop.f32.mrf.mxu1 }
 0x1c7   : > { %v680_v23 = vadd.f32 %v679_v21, %v640_v3  ;;  %v727_v24 = vadd.f32 %v726_v22, %v690_v5  ;;  %894 = vrot.lane.b32.xlu2 %v893_v18, %s2310_s0  ;;  %889 = vrot.lane.b32.xlu0 %v888_v17, %s2310_s0 }
 0x1c8   : > { %v2510_v25 = vpack.c.bf16 %v772_v20, %v772_v20 }
 0x1c9   : > { %v778_v26 = vpack.c.bf16 %v680_v23, %v680_v23  ;;  %v780_v27 = vpack.c.bf16 %v727_v24, %v727_v24 }
 0x1ca   : > { %v852_v28 = vsel %vm850_vm10, %v2510_v25, 0 }
 0x1cb   : > { %v916_v29 = vunpack.c.l.b16 %v778_v26  ;;  %v921_v30 = vunpack.c.l.b16 %v780_v27  ;;  %861 = vmatpush.bf16.msrb.mxu0 %v852_v28  ;;  %1955 = vmatmul.msk.bf16.vlgmr.msra.gmra.mxu3 %vm783_vm9, %v777_v10  ;;  %v807_v31 = vsel %vm783_vm9, %v780_v27, 0 }
 0x1cc   : > { %816 = vmatpush.bf16.xpose.msrb.mxu3 %v807_v31 }
 0x1cd   : > { %v917_v33 = vpack.c.b16 %v916_v29, %v916_v29  ;;  %v922_v34 = vpack.c.b16 %v921_v30, %v921_v30  ;;  %v773_v35 = vpop.f32.mrf.mxu2 }
 0x1ce   : > { %v774_v36 = vadd.f32 %v773_v35, %v737_v13 }
 0x1cf   : > { %923 = vrot.lane.b32.xlu2 %v922_v34, %s2310_s0  ;;  %918 = vrot.lane.b32.xlu1 %v917_v33, %s2310_s0 }
 0x1d0   : > { %v2518_v37 = vpack.c.bf16 %v774_v36, %v774_v36  ;;  %1039 = vrot.lane.b32.xlu0 %v917_v33, %s2311_s2 }
 0x1d2   : > { %v871_v38 = vsel %vm850_vm10, %v2518_v37, 0 }
 0x1d3   : > { %880 = vmatpush.bf16.msrb.mxu1 %v871_v38 }
 0x1d7   : > { %1018 = vrot.lane.b32.xlu2 %v893_v18, %s2311_s2  ;;  %1153 = vrot.lane.b32.xlu1 %v922_v34, %s2312_s4 }
 0x1d8   : > { %1128 = vrot.lane.b32.xlu0 %v888_v17, %s2312_s4 }
 0x1db   : > { %1956 = vmatmul.msk.bf16.vlgmr.msrb.gmra.mxu3 %vm783_vm9, %v778_v26 }
 0x1df   : > { %1041 = vrot.lane.b32.xlu2 %v922_v34, %s2311_s2 }
 0x1e7   : > { %1016 = vrot.lane.b32.xlu2 %v888_v17, %s2311_s2 }
 0x1ef   : > { %1130 = vrot.lane.b32.xlu2 %v893_v18, %s2312_s4 }
 0x1f7   : > { %1151 = vrot.lane.b32.xlu2 %v917_v33, %s2312_s4  ;;  %v993_v33 = vunpack.c.l.b16 %v2518_v37 }
 0x1f9   : > { %v2563_v36 = vpack.c.b16 %v993_v33, %v993_v33 }
 0x221   : > { %v895_v39 = vpop.permute.xlu2 %894 }
 0x222   : > { %v900_v40 = vsel %vm783_vm9, %v895_v39, 0 }
 0x223   : > { %909 = vmatpush.bf16.xpose.msrb.mxu2 %v900_v40 }
 0x229   : > { %v924_v41 = vpop.permute.xlu2 %923 }
 0x22a   : > { %v929_v42 = vsel %vm783_vm9, %v924_v41, 0 }
 0x22b   : > { %938 = vmatpush.bf16.xpose.msra.mxu3 %v929_v42  ;;  %v969_v42 = vunpack.c.l.b16 %v2510_v25 }
 0x22d   : > { %v970_v37 = vpack.c.b16 %v969_v42, %v969_v42 }
 0x231   : > { %v1019_v43 = vpop.permute.xlu2 %1018 }
 0x232   : > { %v1024_v44 = vsel %vm783_vm9, %v1019_v43, 0 }
 0x233   : > { %1033 = vmatpush.bf16.xpose.msra.mxu2 %v1024_v44 }
 0x239   : > { %v1042_v45 = vpop.permute.xlu2 %1041  ;;  %v890_v46 = vpop.permute.xlu0 %889 }
 0x23a   : > { %v1047_v47 = vsel %vm783_vm9, %v1042_v45, 0  ;;  %1959 = vmatmul.msk.bf16.vlgmr.msrb.gmra.mxu2 %vm783_vm9, %v890_v46 }
 0x23b   : > { %1056 = vmatpush.bf16.xpose.msrb.mxu3 %v1047_v47 }
 0x241   : > { %v919_v48 = vpop.permute.xlu1 %918  ;;  %v1017_v49 = vpop.permute.xlu2 %1016 }
 0x242   : > { %1960 = vmatmul.msk.bf16.vlgmr.msra.gmra.mxu3 %vm783_vm9, %v919_v48  ;;  %v1040_v57 = vpop.permute.xlu0 %1039 }
 0x249   : > { %v1154_v50 = vpop.permute.xlu1 %1153  ;;  %v1131_v51 = vpop.permute.xlu2 %1130 }
 0x24a   : > { %v1159_v52 = vsel %vm783_vm9, %v1154_v50, 0  ;;  %v1136_v54 = vsel %vm783_vm9, %v1131_v51, 0  ;;  %1963 = vmatmul.msk.bf16.vlgmr.msra.gmra.mxu2 %vm783_vm9, %v1017_v49  ;;  %v1129_v61 = vpop.permute.xlu0 %1128 }
 0x24b   : > { %1145 = vmatpush.bf16.xpose.msrb.mxu2 %v1136_v54  ;;  %1168 = vmatpush.bf16.xpose.msra.mxu3 %v1159_v52 }
 0x24e   : > { %v799_v56 = vpop.f32.mrf.mxu3 }
 0x24f   : > { %v800_v58 = vadd.f32 %v799_v56, %v2543_v55 }
 0x251   : > { %v823_v59 = vsel %vm822_vm11, %v800_v58, -inf  ;;  %v1152_v0 = vpop.permute.xlu2 %1151 }
 0x252   : > { %1964 = vmatmul.msk.bf16.vlgmr.msrb.gmra.mxu3 %vm783_vm9, %v1040_v57  ;;  %824 = vmax.xlane.f32.xlu1 %v823_v59 }
 0x256   : > { %v801_v60 = vpop.f32.mrf.mxu3 }
 0x25a   : > { %1967 = vmatmul.msk.bf16.vlgmr.msrb.gmra.mxu2 %vm783_vm9, %v1129_v61 }
 0x25e   : > { %v818_v62 = vpop.f32.mrf.mxu3 }
 0x25f   : > { %v819_v63 = vadd.f32 %v818_v62, %v2543_v55 }
 0x261   : > { %v826_v1 = vsel %vm822_vm11, %v819_v63, -inf }
 0x262   : > { %1968 = vmatmul.msk.bf16.vlgmr.msra.gmra.mxu3 %vm783_vm9, %v1152_v0  ;;  %827 = vmax.xlane.f32.xlu0 %v826_v1 }
 0x266   : > { %v820_v3 = vpop.f32.mrf.mxu3 }
 0x2bd   : > { %v911_v5 = vpop.f32.mrf.mxu2 }
 0x2be   : > { %v912_v6 = vadd.f32 %v911_v5, %v2543_v55 }
 0x2c0   : > { %v944_v7 = vsel %vm822_vm11, %v912_v6, -inf }
 0x2c1   : > { %945 = vmax.xlane.f32.xlu2 %v944_v7 }
 0x2c5   : > { %v913_v8 = vpop.f32.mrf.mxu2  ;;  %v940_v9 = vpop.f32.mrf.mxu3 }
 0x2c6   : > { %v941_v10 = vadd.f32 %v940_v9, %v2543_v55  ;;  %v825_v11 = vpop.xlane.xlu1 %824 }
 0x2c7   : > { %v829_v13 = vsub.f32 %v800_v58, %v825_v11 }
 0x2c8   : > { %v947_v14 = vsel %vm822_vm11, %v941_v10, -inf }
 0x2c9   : > { %v831_v15 = vmul.f32 1.442695, %v829_v13  ;;  %948 = vmax.xlane.f32.xlu1 %v947_v14 }
 0x2cb   : > { %2215 = vpow2.f32 %v831_v15 }
 0x2cd   : > { %v942_v16 = vpop.f32.mrf.mxu3  ;;  %v1035_v17 = vpop.f32.mrf.mxu2 }
 0x2ce   : > { %v1036_v18 = vadd.f32 %v1035_v17, %v2543_v55 }
 0x2d0   : > { %v1062_v19 = vsel %vm822_vm11, %v1036_v18, -inf }
 0x2d1   : > { %v2216_v20 = vpop.eup %2215  ;;  %1063 = vmax.xlane.f32.xlu0 %v1062_v19 }
 0x2d2   : > { %v835_v21 = vsel %vm822_vm11, %v2216_v20, 0.0 }
 0x2d3   : > { %836 = vadd.xlane.f32.xlu2 %v835_v21 }
 0x2d5   : > { %v1037_v22 = vpop.f32.mrf.mxu2  ;;  %v1058_v23 = vpop.f32.mrf.mxu3 }
 0x2d6   : > { %v1059_v24 = vadd.f32 %v1058_v23, %v2543_v55  ;;  %v828_v26 = vpop.xlane.xlu0 %827 }
 0x2d7   : > { %v830_v27 = vsub.f32 %v819_v63, %v828_v26 }
 0x2d8   : > { %v1065_v28 = vsel %vm822_vm11, %v1059_v24, -inf }
 0x2d9   : > { %v833_v29 = vmul.f32 1.442695, %v830_v27 }
 0x2db   : > { %2217 = vpow2.f32 %v833_v29  ;;  %1066 = vmax.xlane.f32.xlu2 %v1065_v28 }
 0x2dd   : > { %v1060_v30 = vpop.f32.mrf.mxu3  ;;  %v1147_v31 = vpop.f32.mrf.mxu2 }
 0x2de   : > { %v1148_v40 = vadd.f32 %v1147_v31, %v2543_v55 }
 0x2e0   : > { %v1174_v41 = vsel %vm822_vm11, %v1148_v40, -inf }
 0x2e1   : > { %v2218_v34 = vpop.eup %2217 }
 0x2e2   : > { %v838_v35 = vsel %vm822_vm11, %v2218_v34, 0.0 }
 0x2e3   : > { %839 = vadd.xlane.f32.xlu1 %v838_v35 }
 0x2e5   : > { %v1149_v38 = vpop.f32.mrf.mxu2  ;;  %v1170_v39 = vpop.f32.mrf.mxu3  ;;  %995 = vrot.lane.b32.xlu0 %v2563_v36, %s2310_s0 }
 0x2e6   : > { %v2573_v44 = vadd.f32 %v1170_v39, %v2543_v55 }
 0x2e8   : > { %v1177_v45 = vsel %vm822_vm11, %v2573_v44, -inf }
 0x2eb   : > { %1175 = vmax.xlane.f32.xlu1 %v1174_v41 }
 0x2ed   : > { %v1172_v43 = vpop.f32.mrf.mxu3 }
 0x2f3   : > { %1086 = vrot.lane.b32.xlu2 %v970_v37, %s2311_s2 }
 0x304   : > { %971 = vrot.lane.b32.xlu1 %v970_v37, %s2310_s0 }
 0x30f   : > { %1178 = vmax.xlane.f32.xlu0 %v1177_v45 }
 0x334   : > { %v946_v46 = vpop.xlane.xlu2 %945 }
 0x335   : > { %v950_v47 = vsub.f32 %v912_v6, %v946_v46 }
 0x337   : > { %v952_v48 = vmul.f32 1.442695, %v950_v47 }
 0x339   : > { %2219 = vpow2.f32 %v952_v48 }
 0x33c   : > { %v949_v49 = vpop.xlane.xlu1 %948 }
 0x33d   : > { %v951_v50 = vsub.f32 %v941_v10, %v949_v49 }
 0x33f   : > { %v2577_v25 = vpop.eup %2219  ;;  %v954_v51 = vmul.f32 1.442695, %v951_v50 }
 0x340   : > { %v956_v52 = vsel %vm822_vm11, %v2577_v25, 0.0 }
 0x341   : > { %2221 = vpow2.f32 %v954_v51  ;;  %957 = vadd.xlane.f32.xlu0 %v956_v52 }
 0x344   : > { %v1064_v54 = vpop.xlane.xlu0 %1063 }
 0x345   : > { %v1068_v55 = vsub.f32 %v1036_v18, %v1064_v54 }
 0x346   : > { %v837_v56 = vpop.xlane.xlu2 %836 }
 0x347   : > { %v2222_v57 = vpop.eup %2221  ;;  %v1070_v58 = vmul.f32 1.442695, %v1068_v55  ;;  %2223 = vrcp.f32 %v837_v56 }
 0x348   : > { %v959_v59 = vsel %vm822_vm11, %v2222_v57, 0.0 }
 0x349   : > { %2225 = vpow2.f32 %v1070_v58  ;;  %960 = vadd.xlane.f32.xlu2 %v959_v59 }
 0x34d   : > { %v2224_v60 = vpop.eup %2223 }
 0x34e   : > { %v843_v61 = vmul.f32 %v2224_v60, %v2216_v20  ;;  %v1067_v62 = vpop.xlane.xlu2 %1066 }
 0x34f   : > { %v2226_v63 = vpop.eup %2225  ;;  %v1069_v0 = vsub.f32 %v1059_v24, %v1067_v62 }
 0x350   : > { %v845_v1 = vpack.c.bf16 %v843_v61, %v843_v61  ;;  %v1074_v3 = vsel %vm822_vm11, %v2226_v63, 0.0 }
 0x351   : > { %v1072_v5 = vmul.f32 1.442695, %v1069_v0  ;;  %1075 = vadd.xlane.f32.xlu2 %v1074_v3 }
 0x352   : > { %1957 = vmatmul.msk.bf16.vlgmr.msrb.gmra.mxu0 %vm822_vm11, %v845_v1 }
 0x353   : > { %2227 = vpow2.f32 %v1072_v5 }
 0x355   : > { %1107 = vrot.lane.b32.xlu0 %v2563_v36, %s2311_s2 }
 0x356   : > { %v840_v6 = vpop.xlane.xlu1 %839  ;;  %v1087_v20 = vpop.permute.xlu2 %1086 }
 0x357   : > { %2229 = vrcp.f32 %v840_v6  ;;  %v996_v7 = vpop.permute.xlu0 %995  ;;  %v1092_v23 = vsel %vm850_vm10, %v1087_v20, 0  ;;  %v2113_v20 = vld [vmem:[%s2436_s13 + $0x10] sm:$0xff] }
 0x358   : > { %v1001_v8 = vsel %vm850_vm10, %v996_v7, 0 }
 0x359   : > { %v2228_v9 = vpop.eup %2227  ;;  %1010 = vmatpush.bf16.msra.mxu1 %v1001_v8 }
 0x35a   : > { %v1077_v10 = vsel %vm822_vm11, %v2228_v9, 0.0 }
 0x35b   : > { %1078 = vadd.xlane.f32.xlu2 %v1077_v10 }
 0x35d   : > { %v2230_v11 = vpop.eup %2229 }
 0x35e   : > { %v844_v13 = vmul.f32 %v2230_v11, %v2218_v34  ;;  %v1176_v14 = vpop.xlane.xlu1 %1175 }
 0x35f   : > { %v1180_v15 = vsub.f32 %v1148_v40, %v1176_v14 }
 0x360   : > { %v846_v16 = vpack.c.bf16 %v844_v13, %v844_v13 }
 0x361   : > { %v1182_v17 = vmul.f32 1.442695, %v1180_v15 }
 0x362   : > { %1958 = vmatmul.msk.bf16.vlgmr.msrb.gmra.mxu1 %vm822_vm11, %v846_v16 }
 0x363   : > { %2231 = vpow2.f32 %v1182_v17 }
 0x369   : > { %v2232_v18 = vpop.eup %2231 }
 0x36a   : > { %v1186_v19 = vsel %vm822_vm11, %v2232_v18, 0.0 }
 0x36b   : > { %1187 = vadd.xlane.f32.xlu1 %v1186_v19  ;;  %v2114_v19 = vld [vmem:[%s2436_s13 + $0x18] sm:$0xff] }
 0x36c   : > { %1312 = vmatpush.bf16.msra.mxu2 %v2114_v19 }
 0x370   : > { %1313 = vmatpush.bf16.msra.mxu2 %v2113_v20 }
 0x373   : > { %1198 = vrot.lane.b32.xlu2 %v970_v37, %s2312_s4 }
 0x376   : > { %v972_v21 = vpop.permute.xlu1 %971 }
 0x377   : > { %v977_v22 = vsel %vm850_vm10, %v972_v21, 0  ;;  %v2112_v21 = vld [vmem:[%s2436_s13 + $0x8] sm:$0xff] }
 0x378   : > { %986 = vmatpush.bf16.msra.mxu0 %v977_v22  ;;  %1314 = vmatpush.bf16.msra.mxu2 %v2112_v21  ;;  %v2111_v22 = vld [vmem:[%s2436_s13] sm:$0xff] }
 0x37b   : > { %1219 = vrot.lane.b32.xlu2 %v2563_v36, %s2312_s4 }
 0x37c   : > { %1101 = vmatpush.bf16.msrb.mxu0 %v1092_v23  ;;  %1315 = vmatpush.bf16.msra.mxu2 %v2111_v22 }
 0x382   : > { %v1179_v24 = vpop.xlane.xlu0 %1178 }
 0x383   : > { %v1181_v26 = vsub.f32 %v2573_v44, %v1179_v24 }
 0x385   : > { %v1184_v27 = vmul.f32 1.442695, %v1181_v26 }
 0x387   : > { %2233 = vpow2.f32 %v1184_v27 }
 0x38d   : > { %v2234_v28 = vpop.eup %2233 }
 0x38e   : > { %v1189_v29 = vsel %vm822_vm11, %v2234_v28, 0.0 }
 0x38f   : > { %1190 = vadd.xlane.f32.xlu0 %v1189_v29 }
 0x3b4   : > { %v958_v30 = vpop.xlane.xlu0 %957 }
 0x3b5   : > { %2235 = vrcp.f32 %v958_v30 }
 0x3bb   : > { %v2236_v31 = vpop.eup %2235 }
 0x3bc   : > { %v964_v33 = vmul.f32 %v2236_v31, %v2577_v25  ;;  %v961_v34 = vpop.xlane.xlu2 %960 }
 0x3bd   : > { %2237 = vrcp.f32 %v961_v34 }
 0x3be   : > { %v966_v35 = vpack.c.bf16 %v964_v33, %v964_v33 }
 0x3c0   : > { %1961 = vmatmul.msk.bf16.vlgmr.msra.gmra.mxu0 %vm822_vm11, %v966_v35 }
 0x3c3   : > { %v2238_v36 = vpop.eup %2237 }
 0x3c4   : > { %v965_v38 = vmul.f32 %v2238_v36, %v2222_v57  ;;  %v1076_v39 = vpop.xlane.xlu2 %1075 }
 0x3c5   : > { %2239 = vrcp.f32 %v1076_v39 }
 0x3c6   : > { %v967_v40 = vpack.c.bf16 %v965_v38, %v965_v38 }
 0x3c7   : > { %v1108_v41 = vpop.permute.xlu0 %1107 }
 0x3c8   : > { %v1113_v42 = vsel %vm850_vm10, %v1108_v41, 0  ;;  %1962 = vmatmul.msk.bf16.vlgmr.msra.gmra.mxu1 %vm822_vm11, %v967_v40 }
 0x3c9   : > { %1122 = vmatpush.bf16.msrb.mxu1 %v1113_v42  ;;  %v2618_v42 = vld [vmem:[%s2446_s3] sm:$0x3] }
 0x3cb   : > { %v2240_v43 = vpop.eup %2239 }
 0x3cc   : > { %v1082_v37 = vmul.f32 %v2240_v43, %v2226_v63  ;;  %v1324_v43 = vperm.slane %v2497_v53, 5 }
 0x3ce   : > { %v1084_v44 = vpack.c.bf16 %v1082_v37, %v1082_v37  ;;  %v1079_v45 = vpop.xlane.xlu2 %1078 }
 0x3cf   : > { %2241 = vrcp.f32 %v1079_v45  ;;  %v2601_v46 = vpop.f32.mrf.mxu0 }
 0x3d0   : > { %1965 = vmatmul.msk.bf16.vlgmr.msrb.gmra.mxu0 %vm822_vm11, %v1084_v44 }
 0x3d5   : > { %v2242_v47 = vpop.eup %2241 }
 0x3d6   : > { %v1083_v48 = vmul.f32 %v2242_v47, %v2228_v9  ;;  %v1199_v49 = vpop.permute.xlu2 %1198 }
 0x3d7   : > { %v1204_v50 = vsel %vm850_vm10, %v1199_v49, 0  ;;  %v865_v25 = vpop.f32.mrf.mxu0 }
 0x3d8   : > { %v1085_v51 = vpack.c.bf16 %v1083_v48, %v1083_v48  ;;  %1213 = vmatpush.bf16.msra.mxu0 %v1204_v50 }
 0x3da   : > { %1966 = vmatmul.msk.bf16.vlgmr.msrb.gmra.mxu1 %vm822_vm11, %v1085_v51 }
 0x3de   : > { %v1220_v52 = vpop.permute.xlu2 %1219  ;;  %v1188_v54 = vpop.xlane.xlu1 %1187 }
 0x3df   : > { %v1225_v55 = vsel %vm850_vm10, %v1220_v52, 0  ;;  %2243 = vrcp.f32 %v1188_v54  ;;  %v882_v56 = vpop.f32.mrf.mxu1 }
 0x3e0   : > { %1234 = vmatpush.bf16.msra.mxu1 %v1225_v55 }
 0x3e5   : > { %v2244_v57 = vpop.eup %2243 }
 0x3e6   : > { %v1194_v58 = vmul.f32 %v2244_v57, %v2232_v18 }
 0x3e7   : > { %v884_v59 = vpop.f32.mrf.mxu1 }
 0x3e8   : > { %v1196_v60 = vpack.c.bf16 %v1194_v58, %v1194_v58 }
 0x3ea   : > { %1969 = vmatmul.msk.bf16.vlgmr.msra.gmra.mxu0 %vm822_vm11, %v1196_v60 }
 0x402   : > { %v1191_v61 = vpop.xlane.xlu0 %1190 }
 0x403   : > { %2245 = vrcp.f32 %v1191_v61 }
 0x409   : > { %v2246_v62 = vpop.eup %2245 }
 0x40a   : > { %v1195_v63 = vmul.f32 %v2246_v62, %v2234_v28 }
 0x40c   : > { %v1197_v0 = vpack.c.bf16 %v1195_v63, %v1195_v63 }
 0x40e   : > { %1970 = vmatmul.msk.bf16.vlgmr.msra.gmra.mxu1 %vm822_vm11, %v1197_v0 }
 0x43d   : > { %v988_v1 = vpop.f32.mrf.mxu0 }
 0x445   : > { %v990_v3 = vpop.f32.mrf.mxu0  ;;  %v1012_v5 = vpop.f32.mrf.mxu1 }
 0x446   : > { %v2194_v6 = vpack.i.bf16 %v1012_v5, %v988_v1 }
 0x448   : > { %2195 = vrot.lane.b32.xlu2 %v2194_v6, %s2313_s25 }
 0x44d   : > { %v1014_v7 = vpop.f32.mrf.mxu1  ;;  %v1103_v8 = vpop.f32.mrf.mxu0 }
 0x455   : > { %v1105_v9 = vpop.f32.mrf.mxu0 }
 0x457   : > { %v1124_v10 = vpop.f32.mrf.mxu1 }
 0x458   : > { %v2199_v11 = vpack.i.bf16 %v1124_v10, %v1103_v8 }
 0x45a   : > { %2200 = vrot.lane.b32.xlu1 %v2199_v11, %s2314_s28 }
 0x45f   : > { %v1126_v13 = vpop.f32.mrf.mxu1 }
 0x467   : > { %v1215_v14 = vpop.f32.mrf.mxu0 }
 0x46f   : > { %v1217_v15 = vpop.f32.mrf.mxu0 }
 0x48b   : > { %v1236_v16 = vpop.f32.mrf.mxu1 }
 0x48c   : > { %v2204_v17 = vpack.i.bf16 %v1236_v16, %v1215_v14 }
 0x48e   : > { %2205 = vrot.lane.b32.xlu2 %v2204_v17, %s2315_s12 }
 0x493   : > { %v1238_v18 = vpop.f32.mrf.mxu1 }
 0x4a2   : > { %v2196_v23 = vpop.permute.xlu2 %2195 }
 0x4a3   : > { %v2198_v26 = vunpack.i.h.bf16 %v2196_v23  ;;  %v2197_v27 = vunpack.i.l.bf16 %v2196_v23 }
 0x4a5   : > { %v1265_v31 = vsel %vm783_vm9, %v882_v56, %v2198_v26  ;;  %v1264_v33 = vsel %vm783_vm9, %v2601_v46, %v2197_v27 }
 0x4cc   : > { %v2201_v24 = vpop.permute.xlu1 %2200 }
 0x4cd   : > { %v2203_v28 = vunpack.i.h.bf16 %v2201_v24  ;;  %v2202_v29 = vunpack.i.l.bf16 %v2201_v24 }
 0x4cf   : > { %v1268_v36 = vsel %vm1266_vm12, %v1265_v31, %v2203_v28  ;;  %v1267_v38 = vsel %vm1266_vm12, %v1264_v33, %v2202_v29 }
 0x4e8   : > { %v2206_v30 = vpop.permute.xlu2 %2205 }
 0x4e9   : > { %v2208_v34 = vunpack.i.h.bf16 %v2206_v30  ;;  %v2207_v35 = vunpack.i.l.bf16 %v2206_v30 }
 0x4eb   : > { %v1270_v39 = vsel %vm1269_vm13, %v1267_v38, %v2207_v35  ;;  %v1271_v40 = vsel %vm1269_vm13, %v1268_v36, %v2208_v34 }
 0x4ec   : > { %v1272_v41 = vpack.c.bf16 %v1271_v40, %v1270_v39 }
 0x4ee   : > { %1987 = vmatmul.msk.bf16.vlgmr.msra.gmra.mxu2 %vm573_vm1, %v1272_v41 }
 0x571   : > { %v1317_v37 = vpop.f32.mrf.mxu2 }
 0x572   : > { %v1322_v44 = vadd.f32 %v1317_v37, %v2462_v2 }
 0x574   : > { %v1325_v45 = vadd.f32 %v1324_v43, %v1322_v44 }
 0x576   : > { %1327 = vst.msk [vmem:[%s2456_s30] sm:$0xff] %vm573_vm1, %v1325_v45 }
 0x579   : > { %v1319_v46 = vpop.f32.mrf.mxu2 }
 0x57a   : > { %v1323_v47 = vadd.f32 %v1319_v46, %v2467_v4 }
 0x57c   : > { %v1326_v48 = vadd.f32 %v1324_v43, %v1323_v47 }
 0x57e   : > { %1328 = vst.msk [vmem:[%s2456_s30 + $0x8] sm:$0xff] %vm573_vm1, %v1326_v48 }
 0x57f LB: >> { %s1988_s3 = sshll.u32 %s2307_s15, 3  ;;  %v2015_v54 = vld [vmem:[%s2441_s18 + $0x30] sm:$0xf]  ;;  %v2122_v55 = vld [vmem:[%s2441_s18 + $0x34] sm:$0xf0]  ;;  %v1361_v27 = vperm.slane %v2497_v53, 6  ;;  %s2307_s15 = sphi %s2627_s15, %s1335_s15  }
 0x580   : >> { %s2634_s29 = scalar_lea.vmem %s2456_s30, %s1988_s3  ;;  %v2121_v56 = vld [vmem:[%s2441_s18 + $0x34] sm:$0xf]  ;;  %v2016_v57 = vor.u32 %v2122_v55, %v2015_v54  ;;  %v2017_v58 = vld [vmem:[%s2441_s18 + $0x38] sm:$0xf0]  ;;  %v2007_v60 = vld [vmem:[%s2441_s18 + $0x20] sm:$0xf] }
 0x581   : >> { %v2020_v59 = vor.u32 %v2121_v56, %v2017_v58  ;;  %v2120_v61 = vld [vmem:[%s2441_s18 + $0x24] sm:$0xf0]  ;;  %v2119_v62 = vld [vmem:[%s2441_s18 + $0x24] sm:$0xf]  ;;  %v2009_v0 = vld [vmem:[%s2441_s18 + $0x28] sm:$0xf0] }
 0x582   : >> { %1426 = vmatpush.bf16.msra.mxu0 %v2016_v57  ;;  %v2008_v63 = vor.u32 %v2120_v61, %v2007_v60  ;;  %v2012_v1 = vor.u32 %v2119_v62, %v2009_v0  ;;  %v1999_v3 = vld [vmem:[%s2441_s18 + $0x10] sm:$0xf]  ;;  %v2118_v5 = vld [vmem:[%s2441_s18 + $0x14] sm:$0xf0]  ;;  %v2117_v6 = vld [vmem:[%s2441_s18 + $0x14] sm:$0xf] }
 0x583   : >> { %1439 = vmatpush.bf16.msra.mxu1 %v2020_v59  ;;  %v2000_v7 = vor.u32 %v2118_v5, %v1999_v3  ;;  %v2001_v8 = vld [vmem:[%s2441_s18 + $0x18] sm:$0xf0]  ;;  %v1991_v9 = vld [vmem:[%s2441_s18] sm:$0xf]  ;;  %v2116_v10 = vld [vmem:[%s2441_s18 + $0x4] sm:$0xf0] }
 0x584   : >> { %v2004_v11 = vor.u32 %v2117_v6, %v2001_v8  ;;  %v2115_v13 = vld [vmem:[%s2441_s18 + $0x4] sm:$0xf]  ;;  %v1993_v14 = vld [vmem:[%s2441_s18 + $0x8] sm:$0xf0]  ;;  %v1992_v15 = vor.u32 %v2116_v10, %v1991_v9  ;;  %v1363_v30 = vperm.slane %v2497_v53, 7  ;;  %v2130_v35 = vld [vmem:[%s2451_s5 + $0x38] sm:$0xff] }
 0x585   : >> { %v2637_v2 = vld [vmem:[%s2634_s29] sm:$0xff]  ;;  %v1996_v16 = vor.u32 %v2115_v13, %v1993_v14  ;;  %v2138_v36 = vld [vmem:[%s2451_s5 + $0x78] sm:$0xff]  ;;  %1621 = vmatpush.bf16.msra.mxu2 %v2130_v35  ;;  %v2129_v38 = vld [vmem:[%s2451_s5 + $0x30] sm:$0xff]  ;;  %s1335_s15 = sadd.s32 1, %s2307_s15  }
 0x586   : >> { %v1339_v4 = vsel %vm573_vm1, %v2637_v2, 0.0  ;;  %1427 = vmatpush.bf16.msra.mxu0 %v2008_v63  ;;  %1634 = vmatpush.bf16.msra.mxu3 %v2138_v36  ;;  %v2137_v39 = vld [vmem:[%s2451_s5 + $0x70] sm:$0xff]  ;;  %v2128_v40 = vld [vmem:[%s2451_s5 + $0x28] sm:$0xff]  ;;  %v2127_v43 = vld [vmem:[%s2451_s5 + $0x20] sm:$0xff]  ;;  %p1332_p8 = scmp.ge.s32.totalorder %s1335_s15, 2  }
 0x587   : >> { %1340 = vadd.xlane.f32.xlu0 %v1339_v4  ;;  %1440 = vmatpush.bf16.msra.mxu1 %v2012_v1  ;;  %v2136_v41 = vld [vmem:[%s2451_s5 + $0x68] sm:$0xff]  ;;  %v2135_v37 = vld [vmem:[%s2451_s5 + $0x60] sm:$0xff]  ;;  %v2126_v44 = vld [vmem:[%s2451_s5 + $0x18] sm:$0xff]  ;;  %p2089_p9 = scmp.ne.s32.totalorder (%p1332_p8), %s2287_s17, 1 }
 0x588   : >> { %v2134_v45 = vld [vmem:[%s2451_s5 + $0x58] sm:$0xff]  ;;  %v2125_v46 = vld [vmem:[%s2451_s5 + $0x10] sm:$0xff]  ;;  %v2124_v48 = vld [vmem:[%s2451_s5 + $0x8] sm:$0xff] }
 0x589   : >> { %1622 = vmatpush.bf16.msra.mxu2 %v2129_v38  ;;  %v2133_v47 = vld [vmem:[%s2451_s5 + $0x50] sm:$0xff]  ;;  %v2132_v4 = vld [vmem:[%s2451_s5 + $0x48] sm:$0xff] }
 0x58a   : >> { %1428 = vmatpush.bf16.msra.mxu0 %v2000_v7  ;;  %1635 = vmatpush.bf16.msra.mxu3 %v2137_v39 }
 0x58b   : >> { %1441 = vmatpush.bf16.msra.mxu1 %v2004_v11 }
 0x58d   : >> { %1623 = vmatpush.bf16.msra.mxu2 %v2128_v40 }
 0x58e   : >> { %1429 = vmatpush.bf16.msra.mxu0 %v1992_v15  ;;  %1636 = vmatpush.bf16.msra.mxu3 %v2136_v41 }
 0x58f   : >> { %1442 = vmatpush.bf16.msra.mxu1 %v1996_v16 }
 0x591   : >> { %1624 = vmatpush.bf16.msra.mxu2 %v2127_v43 }
 0x592   : >> { %1637 = vmatpush.bf16.msra.mxu3 %v2135_v37 }
 0x595   : >> { %1625 = vmatpush.bf16.msra.mxu2 %v2126_v44 }
 0x596   : >> { %1638 = vmatpush.bf16.msra.mxu3 %v2134_v45 }
 0x599   : >> { %1626 = vmatpush.bf16.msra.mxu2 %v2125_v46 }
 0x59a   : >> { %1639 = vmatpush.bf16.msra.mxu3 %v2133_v47 }
 0x59d   : >> { %1627 = vmatpush.bf16.msra.mxu2 %v2124_v48 }
 0x59e   : >> { %1640 = vmatpush.bf16.msra.mxu3 %v2132_v4 }
 0x5fa   : >> { %v1341_v49 = vpop.xlane.xlu0 %1340 }
 0x5fb   : >> { %v1342_v50 = vmul.f32 %v1341_v49, %v2471_v12  ;;  %v1375_v49 = vperm.slane %v2618_v42, 0 }
 0x5fd   : >> { %v1343_v25 = vsub.f32 %v2637_v2, %v1342_v50  ;;  %v1376_v50 = vperm.slane %v2618_v42, 1 }
 0x5ff   : >> { %v1344_v51 = vmul.f32 %v1343_v25, %v1343_v25 }
 0x601   : >> { %v1345_v52 = vsel %vm573_vm1, %v1344_v51, 0.0  ;;  %v2131_v51 = vld [vmem:[%s2451_s5 + $0x40] sm:$0xff] }
 0x602   : >> { %1346 = vadd.xlane.f32.xlu0 %v1345_v52  ;;  %1641 = vmatpush.bf16.msra.mxu3 %v2131_v51 }
 0x675   : >> { %v1347_v17 = vpop.xlane.xlu0 %1346 }
 0x676   : >> { %v1348_v18 = vmul.f32 %v1347_v17, %v2471_v12 }
 0x678   : >> { %v1349_v19 = vadd.f32 1e-05, %v1348_v18 }
 0x67a   : >> { %2247 = vrsqrt.f32 %v1349_v19  ;;  %vm1356_vm15 = vweird.f32 %v1349_v19 }
 0x680   : >> { %v2248_v20 = vpop.eup %2247 }
 0x681   : >> { %v1351_v21 = vmul.f32 %v2248_v20, %v1349_v19  ;;  %vm1357_vm14 = vweird.f32 %v2248_v20 }
 0x682   : >> { %vm1358_vm0 = vmor %vm1356_vm15, %vm1357_vm14 }
 0x683   : >> { %v1352_v22 = vmul.f32 %v2248_v20, %v1351_v21 }
 0x685   : >> { %v1353_v23 = vmul.f32 0.5, %v1352_v22 }
 0x687   : >> { %v1354_v24 = vsub.f32 1.5, %v1353_v23 }
 0x689   : >> { %v1355_v26 = vmul.f32 %v2248_v20, %v1354_v24 }
 0x68b   : >> { %v1359_v28 = vsel %vm1358_vm0, %v2248_v20, %v1355_v26 }
 0x68c   : >> { %v1360_v29 = vmul.f32 %v1359_v28, %v1343_v25  ;;  %v2123_v25 = vld [vmem:[%s2451_s5] sm:$0xff] }
 0x68d   : >> { %1628 = vmatpush.bf16.msra.mxu2 %v2123_v25 }
 0x68e   : >> { %v1362_v31 = vmul.f32 %v1361_v27, %v1360_v29 }
 0x690   : >> { %v1364_v33 = vadd.f32 %v1363_v30, %v1362_v31  ;;  %v1524_v31 = vperm.slane %v2489_v32, 0 }
 0x692   : >> { %v1365_v34 = vpack.c.bf16 %v1364_v33, %v1364_v33 }
 0x694   : >> { %2021 = vmatmul.msk.bf16.vlgmr.msra.gmra.mxu0 %vm573_vm1, %v1365_v34  ;;  %2022 = vmatmul.msk.bf16.vlgmr.msra.gmra.mxu1 %vm573_vm1, %v1365_v34 }
 0x711   : >> { %v1431_v52 = vpop.f32.mrf.mxu0  ;;  %v1444_v54 = vpop.f32.mrf.mxu1 }
 0x712   : >> { %v1432_v55 = vadd.f32 %v1431_v52, %v1375_v49  ;;  %v1445_v56 = vadd.f32 %v1444_v54, %v1376_v50 }
 0x714   : >> { %v2023_v57 = vmul.f32 -1.702, %v1432_v55  ;;  %v2024_v58 = vmul.f32 -1.702, %v1445_v56 }
 0x716   : >> { %v1452_v59 = vmul.f32 1.442695, %v2023_v57  ;;  %v1454_v60 = vmul.f32 1.442695, %v2024_v58 }
 0x718   : >> { %2249 = vpow2.f32 %v1452_v59 }
 0x719   : >> { %2251 = vpow2.f32 %v1454_v60  ;;  %v1433_v61 = vpop.f32.mrf.mxu0  ;;  %v1446_v62 = vpop.f32.mrf.mxu1 }
 0x71e   : >> { %v2250_v63 = vpop.eup %2249 }
 0x71f   : >> { %v2252_v0 = vpop.eup %2251  ;;  %v1456_v1 = vadd.f32 1.0, %v2250_v63 }
 0x720   : >> { %v1457_v3 = vadd.f32 1.0, %v2252_v0 }
 0x721   : >> { %2253 = vrcp.f32 %v1456_v1  ;;  %v1469_v10 = vand.u32 2147483648, %v1456_v1  ;;  %v1467_v14 = vand.u32 2147483647, %v1456_v1  ;;  %vm1463_vm4 = vweird.f32 %v1456_v1 }
 0x722   : >> { %2255 = vrcp.f32 %v1457_v3  ;;  %v1484_v15 = vand.u32 2147483648, %v1457_v3  ;;  %v1482_v17 = vand.u32 2147483647, %v1457_v3  ;;  %vm1478_vm6 = vweird.f32 %v1457_v3 }
 0x723   : >> { %v1470_v19 = vor.u32 1.1754944e-38, %v1469_v10  ;;  %vm1468_vm7 = vcmp.eq.f32.partialorder %v1467_v14, 8.507059e+37 }
 0x724   : >> { %v1485_v22 = vor.u32 1.1754944e-38, %v1484_v15  ;;  %vm1483_vm9 = vcmp.eq.f32.partialorder %v1482_v17, 8.507059e+37 }
 0x727   : >> { %v2254_v5 = vpop.eup %2253 }
 0x728   : >> { %v2256_v6 = vpop.eup %2255  ;;  %v1459_v7 = vmul.f32 %v2254_v5, %v1456_v1  ;;  %vm1464_vm2 = vweird.f32 %v2254_v5 }
 0x729   : >> { %v1474_v8 = vmul.f32 %v2256_v6, %v1457_v3  ;;  %vm1479_vm3 = vweird.f32 %v2256_v6  ;;  %vm1465_vm5 = vmor %vm1463_vm4, %vm1464_vm2 }
 0x72a   : >> { %v1460_v9 = vsub.f32 1.0, %v1459_v7  ;;  %vm1480_vm8 = vmor %vm1478_vm6, %vm1479_vm3 }
 0x72b   : >> { %v1475_v11 = vsub.f32 1.0, %v1474_v8 }
 0x72c   : >> { %v1461_v13 = vmul.f32 %v2254_v5, %v1460_v9 }
 0x72d   : >> { %v1476_v16 = vmul.f32 %v2256_v6, %v1475_v11 }
 0x72e   : >> { %v1462_v18 = vadd.f32 %v2254_v5, %v1461_v13 }
 0x72f   : >> { %v1477_v20 = vadd.f32 %v2256_v6, %v1476_v16 }
 0x730   : >> { %v1466_v21 = vsel %vm1465_vm5, %v2254_v5, %v1462_v18 }
 0x731   : >> { %v1471_v23 = vsel %vm1468_vm7, %v1470_v19, %v1466_v21  ;;  %v1481_v24 = vsel %vm1480_vm8, %v2256_v6, %v1477_v20 }
 0x732   : >> { %v1488_v26 = vmul.f32 %v1471_v23, %v1432_v55  ;;  %v1486_v27 = vsel %vm1483_vm9, %v1485_v22, %v1481_v24 }
 0x733   : >> { %v1489_v28 = vmul.f32 %v1486_v27, %v1445_v56 }
 0x734   : >> { %v1490_v29 = vpack.c.bf16 %v1488_v26, %v1488_v26 }
 0x735   : >> { %v1491_v30 = vpack.c.bf16 %v1489_v28, %v1489_v28 }
 0x736   : >> { %1629 = vmatmul.bf16.vlgmr.msra.gmra.mxu2 %v1490_v29 }
 0x737   : >> { %1642 = vmatmul.bf16.vlgmr.msra.gmra.mxu3 %v1491_v30 }
 0x7b9   : >> { %v1630_v33 = vpop.f32.mrf.mxu2 }
 0x7ba   : >> { %v1631_v34 = vadd.f32 %v1630_v33, %v1524_v31  ;;  %v1643_v35 = vpop.f32.mrf.mxu3 }
 0x7bc   : >> { %v1644_v36 = vadd.f32 %v1643_v35, %v1631_v34 }
 0x7be   : >> { %v1647_v38 = vadd.f32 %v1644_v36, %v2637_v2  ;;  %1334 = sbr.rel (!%p1332_p8) target bundleno = 1407 (0x57f), region = 134 }
 0x7c0   : >> { %1648 = vst.msk [vmem:[%s2634_s29] sm:$0xff] %vm573_vm1, %v1647_v38 }
 0x7c1   : >> { %v1632_v39 = vpop.f32.mrf.mxu2 }
 0x7c2   : >> { %v1645_v40 = vpop.f32.mrf.mxu3 }
 0x7c3   : > { %1652 = sbr.rel (%p2089_p9) target bundleno = 2270 (0x8de), region = 79 }
 0x7c8   : > { %v1654_v41 = vld [vmem:[%s2456_s30] sm:$0xff]  ;;  %v1655_v2 = vld [vmem:[%s2456_s30 + $0x8] sm:$0xff] }
 0x7c9   : > { %v1656_v43 = vsel %vm573_vm1, %v1654_v41, 0.0  ;;  %v1659_v37 = vsel %vm573_vm1, %v1655_v2, 0.0  ;;  %v1653_v60 = vld [vmem:[%s2733_s10] sm:$0x3] }
 0x7ca   : > { %1657 = vadd.xlane.f32.xlu0 %v1656_v43  ;;  %v1700_v1 = vperm.slane %v1653_v60, 0  ;;  %v1703_v6 = vperm.slane %v1653_v60, 1 }
 0x7d2   : > { %1660 = vadd.xlane.f32.xlu0 %v1659_v37 }
 0x83d   : > { %v1658_v44 = vpop.xlane.xlu0 %1657 }
 0x83e   : > { %v1662_v45 = vmul.f32 %v1658_v44, %v2471_v12 }
 0x840   : > { %v1664_v46 = vsub.f32 %v1654_v41, %v1662_v45 }
 0x842   : > { %v1666_v47 = vmul.f32 %v1664_v46, %v1664_v46 }
 0x844   : > { %v1668_v48 = vsel %vm573_vm1, %v1666_v47, 0.0 }
 0x845   : > { %1669 = vadd.xlane.f32.xlu1 %v1668_v48  ;;  %v1661_v32 = vpop.xlane.xlu0 %1660 }
 0x846   : > { %v1663_v53 = vmul.f32 %v1661_v32, %v2471_v12 }
 0x848   : > { %v1665_v42 = vsub.f32 %v1655_v2, %v1663_v53 }
 0x84a   : > { %v1667_v4 = vmul.f32 %v1665_v42, %v1665_v42 }
 0x84c   : > { %v1671_v49 = vsel %vm573_vm1, %v1667_v4, 0.0 }
 0x84d   : > { %1672 = vadd.xlane.f32.xlu1 %v1671_v49 }
 0x8b8   : > { %v1670_v50 = vpop.xlane.xlu1 %1669 }
 0x8b9   : > { %v1674_v25 = vmul.f32 %v1670_v50, %v2471_v12 }
 0x8bb   : > { %v1676_v51 = vadd.f32 1e-05, %v1674_v25 }
 0x8bd   : > { %2257 = vrsqrt.f32 %v1676_v51  ;;  %vm1684_vm11 = vweird.f32 %v1676_v51 }
 0x8c0   : > { %v1673_v52 = vpop.xlane.xlu1 %1672 }
 0x8c1   : > { %v1675_v54 = vmul.f32 %v1673_v52, %v2471_v12 }
 0x8c3   : > { %v2258_v55 = vpop.eup %2257  ;;  %v1677_v56 = vadd.f32 1e-05, %v1675_v54 }
 0x8c4   : > { %v1679_v57 = vmul.f32 %v2258_v55, %v1676_v51  ;;  %vm1685_vm10 = vweird.f32 %v2258_v55 }
 0x8c5   : > { %2259 = vrsqrt.f32 %v1677_v56  ;;  %vm1686_vm12 = vmor %vm1684_vm11, %vm1685_vm10  ;;  %vm1694_vm14 = vweird.f32 %v1677_v56 }
 0x8c6   : > { %v1680_v58 = vmul.f32 %v2258_v55, %v1679_v57 }
 0x8c8   : > { %v1681_v59 = vmul.f32 0.5, %v1680_v58 }
 0x8ca   : > { %v1682_v61 = vsub.f32 1.5, %v1681_v59 }
 0x8cb   : > { %v2260_v62 = vpop.eup %2259 }
 0x8cc   : > { %v1683_v63 = vmul.f32 %v2258_v55, %v1682_v61  ;;  %v1689_v0 = vmul.f32 %v2260_v62, %v1677_v56  ;;  %vm1695_vm13 = vweird.f32 %v2260_v62 }
 0x8cd   : > { %vm1696_vm15 = vmor %vm1694_vm14, %vm1695_vm13 }
 0x8ce   : > { %v1687_v12 = vsel %vm1686_vm12, %v2258_v55, %v1683_v63  ;;  %v1690_v3 = vmul.f32 %v2260_v62, %v1689_v0 }
 0x8cf   : > { %v1698_v5 = vmul.f32 %v1687_v12, %v1664_v46 }
 0x8d0   : > { %v1691_v7 = vmul.f32 0.5, %v1690_v3 }
 0x8d1   : > { %v1701_v8 = vmul.f32 %v1700_v1, %v1698_v5 }
 0x8d2   : > { %v1692_v9 = vsub.f32 1.5, %v1691_v7 }
 0x8d3   : > { %v1704_v10 = vadd.f32 %v1703_v6, %v1701_v8 }
 0x8d4   : > { %v1693_v11 = vmul.f32 %v2260_v62, %v1692_v9 }
 0x8d5   : > { %1706 = vst.msk [vmem:[%s2456_s30] sm:$0xff] %vm573_vm1, %v1704_v10 }
 0x8d6   : > { %v1697_v13 = vsel %vm1696_vm15, %v2260_v62, %v1693_v11 }
 0x8d7   : > { %v1699_v14 = vmul.f32 %v1697_v13, %v1665_v42 }
 0x8d9   : > { %v1702_v15 = vmul.f32 %v1700_v1, %v1699_v14 }
 0x8db   : > { %v1705_v16 = vadd.f32 %v1703_v6, %v1702_v15 }
 0x8dd   : > { %1707 = vst.msk [vmem:[%s2456_s30 + $0x8] sm:$0xff] %vm573_vm1, %v1705_v16 }
 0x8de PF: > { %s2753_s13 = sld [smem:[#allocation4_spill]] }
 0x8df   : > { %s2754_s17 = sld [smem:[#allocation2_spill]] }
 0x8e0   : > { %s2755_s18 = sld [smem:[#allocation3_spill]] }
 0x8e1   : > { %s2756_s19 = sld [smem:[#allocation5_spill]] }
 0x8e2   : > { %s2757_s20 = sld [smem:[#allocation6_spill]] }
 0x8e4   : > { %s21_s21 = sadd.s32 1, %s2753_s13  }
 0x8e5   : > { %p18_p10 = scmp.ge.s32.totalorder %s21_s21, 6  }
 0x8e7   :  { %20 = sbr.rel (!%p18_p10) target bundleno = 6 (0x6), region = 145 }

</bundles_post_ra>
